<compile_context>
chip_gen: v5e
topology: v5e:2x2
jax: 0.10.0
libtpu: 0.0.40
codegen_flags: <defaults>
</compile_context>

<pallas_src>
import jax
import jax.numpy as jnp
from jax import lax
from jax.experimental import pallas as pl
from jax.experimental.pallas import tpu as pltpu

EMBEDDING_SIZE = 10
HIDDEN_SIZE = 4
INPUT_SIZE = 4      # vocab size
NUM_CLASSES = 4
NUM_LAYERS = 2

# Row layout of the packed parameter slab (every block has 4 == HIDDEN_SIZE == NUM_CLASSES cols).
ROW_EMBW0 = 0                        # V rows : emb @ W_ih0^T + (b_ih0 + b_hh0)
ROW_WHH0 = ROW_EMBW0 + INPUT_SIZE    # H rows : W_hh0^T
ROW_WIH1 = ROW_WHH0 + HIDDEN_SIZE    # H rows : W_ih1^T
ROW_WHH1 = ROW_WIH1 + HIDDEN_SIZE    # H rows : W_hh1^T
ROW_B1 = ROW_WHH1 + HIDDEN_SIZE      # 1 row  : b_ih1 + b_hh1
ROW_FCW = ROW_B1 + 1                 # H rows : fc_w^T
ROW_FCB = ROW_FCW + HIDDEN_SIZE      # 1 row  : fc_b
SLAB_ROWS = ROW_FCB + 1              # 22


def make_rnn_kernel(B, T):
    """Kernel for static batch B and sequence length T (runs once; no grid)."""
    H = HIDDEN_SIZE

    def kernel(ids_ref,   # SMEM (B*T,) int32 token ids, batch-major flatten (row = b*T + t)
               w_ref,     # VMEM (SLAB_ROWS, H) f32 packed parameter slab
               out_ref):  # VMEM (B*T, C)  f32 output == x.view(-1, num_classes)
        # Static slices of the single packed parameter tile -> register values.
        whh0 = w_ref[ROW_WHH0:ROW_WHH0 + H, :]   # (H, H)  W_hh0^T
        wih1 = w_ref[ROW_WIH1:ROW_WIH1 + H, :]   # (H, H)  W_ih1^T
        whh1 = w_ref[ROW_WHH1:ROW_WHH1 + H, :]   # (H, H)  W_hh1^T
        b1 = w_ref[ROW_B1:ROW_B1 + 1, :]         # (1, H)  b_ih1 + b_hh1
        fcw = w_ref[ROW_FCW:ROW_FCW + H, :]      # (H, C)  fc weight^T
        fcb = w_ref[ROW_FCB:ROW_FCB + 1, :]      # (1, C)  fc bias

        def vpu_mm(x, w, init=None):
            # (rows, K) @ (K, cols) as K broadcast-FMAs on the VPU.  At these shapes the
            # MXU gives zero throughput benefit and its result-FIFO latency would sit on
            # the serial recurrence critical path (esp. v5e/v6e MRF), so stay on the VPU.
            acc = init
            for k in range(w.shape[0]):
                p = x[:, k:k + 1] * w[k:k + 1, :]
                acc = p if acc is None else acc + p
            return acc

        # ---- fused embedding + layer-0 input projection, hoisted out of the time loop ----
        # Slab row `tok` is emb[tok] @ W_ih0^T + b_ih0 + b_hh0 (bias fold exact: row select).
        # The 16 dynamic-row gathers are independent of the recurrence and pipeline freely.
        x_steps = []
        for t in range(T):
            rows = [w_ref[pl.ds(ROW_EMBW0 + ids_ref[b * T + t], 1), :] for b in range(B)]
            x_steps.append(jnp.concatenate(rows, axis=0))         # (B, H)

        # ---- recurrence: hidden states carried in vregs, T statically unrolled ----
        h0 = jnp.zeros((B, H), jnp.float32)   # == torch.zeros(num_layers, B, H)
        h1 = jnp.zeros((B, H), jnp.float32)
        ys = []
        for t in range(T):
            rec0 = vpu_mm(h0, whh0)               # h0_{t-1} @ W_hh0^T (independent of tanh below)
            rec1 = vpu_mm(h1, whh1, init=b1)      # h1_{t-1} @ W_hh1^T + b1 (independent)
            h0 = jnp.tanh(x_steps[t] + rec0)      # layer-0 biases already folded into the gather
            h1 = jnp.tanh(vpu_mm(h0, wih1, init=rec1))
            ys.append(h1)                         # (B, H), kept in registers

        # ---- batch-major reassembly (register concat) + single FC + single store ----
        y_bm = jnp.concatenate(
            [ys[t][b:b + 1, :] for b in range(B) for t in range(T)], axis=0)   # (B*T, H)
        out_ref[...] = vpu_mm(y_bm, fcw, init=fcb)                              # (B*T, C)

    return kernel


def init_params(key):
    ks = jax.random.split(key, 11)
    u = lambda k, shape, bound: jax.random.uniform(
        k, shape, jnp.float32, minval=-bound, maxval=bound)
    h_bound = 1.0 / (HIDDEN_SIZE ** 0.5)
    return {
        # nn.Embedding: N(0, 1)
        "emb":   jax.random.normal(ks[0], (INPUT_SIZE, EMBEDDING_SIZE), jnp.float32),
        # nn.RNN layer 0 (PyTorch layout: (H, E) / (H, H) / (H,))
        "w_ih0": u(ks[1], (HIDDEN_SIZE, EMBEDDING_SIZE), h_bound),
        "w_hh0": u(ks[2], (HIDDEN_SIZE, HIDDEN_SIZE), h_bound),
        "b_ih0": u(ks[3], (HIDDEN_SIZE,), h_bound),
        "b_hh0": u(ks[4], (HIDDEN_SIZE,), h_bound),
        # nn.RNN layer 1
        "w_ih1": u(ks[5], (HIDDEN_SIZE, HIDDEN_SIZE), h_bound),
        "w_hh1": u(ks[6], (HIDDEN_SIZE, HIDDEN_SIZE), h_bound),
        "b_ih1": u(ks[7], (HIDDEN_SIZE,), h_bound),
        "b_hh1": u(ks[8], (HIDDEN_SIZE,), h_bound),
        # nn.Linear(H, C): (C, H) / (C,)
        "fc_w":  u(ks[9], (NUM_CLASSES, HIDDEN_SIZE), h_bound),
        "fc_b":  u(ks[10], (NUM_CLASSES,), h_bound),
    }


def prepare_kernel_params(params):
    """One-time prep: fuse emb+W_ih0+layer-0 biases, pre-transpose, pack into ONE slab."""
    hi = jax.lax.Precision.HIGHEST
    embw0 = (jnp.dot(params["emb"], params["w_ih0"].T, precision=hi)
             + (params["b_ih0"] + params["b_hh0"])[None, :])            # (V, H)
    slab = jnp.concatenate([
        embw0,                                                          # ROW_EMBW0..
        params["w_hh0"].T,                                              # ROW_WHH0..
        params["w_ih1"].T,                                              # ROW_WIH1..
        params["w_hh1"].T,                                              # ROW_WHH1..
        (params["b_ih1"] + params["b_hh1"])[None, :],                   # ROW_B1
        params["fc_w"].T,                                               # ROW_FCW..
        params["fc_b"][None, :],                                        # ROW_FCB
    ], axis=0).astype(jnp.float32)
    assert slab.shape == (SLAB_ROWS, HIDDEN_SIZE)
    return {"slab": slab}


def model_forward(x_ids, kparams):
    """x_ids: int32 (B, T) token indices in [0, INPUT_SIZE). Returns (B*T, NUM_CLASSES)."""
    B, T = x_ids.shape
    N = B * T
    ids_flat = x_ids.astype(jnp.int32).reshape(N)     # batch-major flatten == output row order

    # Advisory hint: this custom call is tiny (keeps XLA scheduling around it aggressive).
    flops = B * T * (3 * 2 * HIDDEN_SIZE * HIDDEN_SIZE + 6 * HIDDEN_SIZE) \
        + 2 * N * HIDDEN_SIZE * NUM_CLASSES
    cost = pl.CostEstimate(
        flops=flops,
        transcendentals=2 * B * T * HIDDEN_SIZE,
        bytes_accessed=N * 4 + SLAB_ROWS * HIDDEN_SIZE * 4 + N * NUM_CLASSES * 4)

    out = pl.pallas_call(
        make_rnn_kernel(B, T),
        out_shape=jax.ShapeDtypeStruct((N, NUM_CLASSES), jnp.float32),
        in_specs=[
            pl.BlockSpec(memory_space=pltpu.MemorySpace.SMEM),   # token ids -> SMEM scalars
            pl.BlockSpec(memory_space=pltpu.MemorySpace.VMEM),   # packed parameter slab
        ],
        out_specs=pl.BlockSpec(memory_space=pltpu.MemorySpace.VMEM),
        cost_estimate=cost,
    )(ids_flat, kparams["slab"])
    return out   # already matches PyTorch's x.view(-1, num_classes)


def model_forward_ref(x_ids, params):
    """Pure-JAX reference of the same forward (f32-accurate matmuls), for checking."""
    hi = jax.lax.Precision.HIGHEST
    emb = jnp.take(params["emb"], x_ids, axis=0)            # (B, T, E)
    B, T, _ = emb.shape

    def step(carry, x_t):
        h0, h1 = carry
        h0n = jnp.tanh(jnp.dot(x_t, params["w_ih0"].T, precision=hi) + params["b_ih0"]
                       + jnp.dot(h0, params["w_hh0"].T, precision=hi) + params["b_hh0"])
        h1n = jnp.tanh(jnp.dot(h0n, params["w_ih1"].T, precision=hi) + params["b_ih1"]
                       + jnp.dot(h1, params["w_hh1"].T, precision=hi) + params["b_hh1"])
        return (h0n, h1n), h1n

    h0 = jnp.zeros((B, HIDDEN_SIZE), jnp.float32)
    h1 = jnp.zeros((B, HIDDEN_SIZE), jnp.float32)
    _, ys = lax.scan(step, (h0, h1), jnp.transpose(emb, (1, 0, 2)))    # (T, B, H)
    y = jnp.dot(jnp.transpose(ys, (1, 0, 2)), params["fc_w"].T, precision=hi) + params["fc_b"]
    return y.reshape(-1, NUM_CLASSES)


if __name__ == "__main__":
    key = jax.random.PRNGKey(0)
    k_param, k_data = jax.random.split(key)

    params = init_params(k_param)
    kparams = prepare_kernel_params(params)

    B, T = 2, 8
    x_ids = jax.random.randint(k_data, (B, T), 0, INPUT_SIZE, dtype=jnp.int32)

    fwd = jax.jit(model_forward)
    out = jax.block_until_ready(fwd(x_ids, kparams))

    ref = jax.block_until_ready(model_forward_ref(x_ids, params))
    assert out.shape == (B * T, NUM_CLASSES)
    assert jnp.allclose(out, ref, atol=1e-4, rtol=1e-4)

    print("KERNEL_OK")
</pallas_src>

<mosaic_0001>
module attributes {stable_mosaic.version = 11 : i64} {
  func.func @kernel(%arg0: memref<16xi32, #tpu.memory_space<smem>>, %arg1: memref<22x4xf32, #tpu.memory_space<vmem>>, %arg2: memref<16x4xf32, #tpu.memory_space<vmem>>) attributes {dimension_semantics = [], scalar_prefetch = 0 : i64, scratch_operands = 0 : i64, tpu.core_type = #tpu.core_type<tc>} {
    %c4 = arith.constant 4 : index
    %c0 = arith.constant 0 : index
    %0 = vector.load %arg1[%c4, %c0] : memref<22x4xf32, #tpu.memory_space<vmem>>, vector<4x4xf32>
    %c8 = arith.constant 8 : index
    %c0_0 = arith.constant 0 : index
    %1 = vector.load %arg1[%c8, %c0_0] : memref<22x4xf32, #tpu.memory_space<vmem>>, vector<4x4xf32>
    %c12 = arith.constant 12 : index
    %c0_1 = arith.constant 0 : index
    %2 = vector.load %arg1[%c12, %c0_1] : memref<22x4xf32, #tpu.memory_space<vmem>>, vector<4x4xf32>
    %c16 = arith.constant 16 : index
    %c0_2 = arith.constant 0 : index
    %3 = vector.load %arg1[%c16, %c0_2] : memref<22x4xf32, #tpu.memory_space<vmem>>, vector<1x4xf32>
    %c17 = arith.constant 17 : index
    %c0_3 = arith.constant 0 : index
    %4 = vector.load %arg1[%c17, %c0_3] : memref<22x4xf32, #tpu.memory_space<vmem>>, vector<4x4xf32>
    %c21 = arith.constant 21 : index
    %c0_4 = arith.constant 0 : index
    %5 = vector.load %arg1[%c21, %c0_4] : memref<22x4xf32, #tpu.memory_space<vmem>>, vector<1x4xf32>
    %c0_5 = arith.constant 0 : index
    %6 = memref.load %arg0[%c0_5] : memref<16xi32, #tpu.memory_space<smem>>
    %c0_i32 = arith.constant 0 : i32
    %7 = arith.addi %c0_i32, %6 : i32
    %8 = arith.index_cast %7 : i32 to index
    %c0_6 = arith.constant 0 : index
    %9 = vector.load %arg1[%8, %c0_6] : memref<22x4xf32, #tpu.memory_space<vmem>>, vector<1x4xf32>
    %c8_7 = arith.constant 8 : index
    %10 = memref.load %arg0[%c8_7] : memref<16xi32, #tpu.memory_space<smem>>
    %c0_i32_8 = arith.constant 0 : i32
    %11 = arith.addi %c0_i32_8, %10 : i32
    %12 = arith.index_cast %11 : i32 to index
    %c0_9 = arith.constant 0 : index
    %13 = vector.load %arg1[%12, %c0_9] : memref<22x4xf32, #tpu.memory_space<vmem>>, vector<1x4xf32>
    %14 = tpu.concatenate %9, %13 in 0 : vector<1x4xf32>, vector<1x4xf32> -> vector<2x4xf32>
    %c1 = arith.constant 1 : index
    %15 = memref.load %arg0[%c1] : memref<16xi32, #tpu.memory_space<smem>>
    %c0_i32_10 = arith.constant 0 : i32
    %16 = arith.addi %c0_i32_10, %15 : i32
    %17 = arith.index_cast %16 : i32 to index
    %c0_11 = arith.constant 0 : index
    %18 = vector.load %arg1[%17, %c0_11] : memref<22x4xf32, #tpu.memory_space<vmem>>, vector<1x4xf32>
    %c9 = arith.constant 9 : index
    %19 = memref.load %arg0[%c9] : memref<16xi32, #tpu.memory_space<smem>>
    %c0_i32_12 = arith.constant 0 : i32
    %20 = arith.addi %c0_i32_12, %19 : i32
    %21 = arith.index_cast %20 : i32 to index
    %c0_13 = arith.constant 0 : index
    %22 = vector.load %arg1[%21, %c0_13] : memref<22x4xf32, #tpu.memory_space<vmem>>, vector<1x4xf32>
    %23 = tpu.concatenate %18, %22 in 0 : vector<1x4xf32>, vector<1x4xf32> -> vector<2x4xf32>
    %c2 = arith.constant 2 : index
    %24 = memref.load %arg0[%c2] : memref<16xi32, #tpu.memory_space<smem>>
    %c0_i32_14 = arith.constant 0 : i32
    %25 = arith.addi %c0_i32_14, %24 : i32
    %26 = arith.index_cast %25 : i32 to index
    %c0_15 = arith.constant 0 : index
    %27 = vector.load %arg1[%26, %c0_15] : memref<22x4xf32, #tpu.memory_space<vmem>>, vector<1x4xf32>
    %c10 = arith.constant 10 : index
    %28 = memref.load %arg0[%c10] : memref<16xi32, #tpu.memory_space<smem>>
    %c0_i32_16 = arith.constant 0 : i32
    %29 = arith.addi %c0_i32_16, %28 : i32
    %30 = arith.index_cast %29 : i32 to index
    %c0_17 = arith.constant 0 : index
    %31 = vector.load %arg1[%30, %c0_17] : memref<22x4xf32, #tpu.memory_space<vmem>>, vector<1x4xf32>
    %32 = tpu.concatenate %27, %31 in 0 : vector<1x4xf32>, vector<1x4xf32> -> vector<2x4xf32>
    %c3 = arith.constant 3 : index
    %33 = memref.load %arg0[%c3] : memref<16xi32, #tpu.memory_space<smem>>
    %c0_i32_18 = arith.constant 0 : i32
    %34 = arith.addi %c0_i32_18, %33 : i32
    %35 = arith.index_cast %34 : i32 to index
    %c0_19 = arith.constant 0 : index
    %36 = vector.load %arg1[%35, %c0_19] : memref<22x4xf32, #tpu.memory_space<vmem>>, vector<1x4xf32>
    %c11 = arith.constant 11 : index
    %37 = memref.load %arg0[%c11] : memref<16xi32, #tpu.memory_space<smem>>
    %c0_i32_20 = arith.constant 0 : i32
    %38 = arith.addi %c0_i32_20, %37 : i32
    %39 = arith.index_cast %38 : i32 to index
    %c0_21 = arith.constant 0 : index
    %40 = vector.load %arg1[%39, %c0_21] : memref<22x4xf32, #tpu.memory_space<vmem>>, vector<1x4xf32>
    %41 = tpu.concatenate %36, %40 in 0 : vector<1x4xf32>, vector<1x4xf32> -> vector<2x4xf32>
    %c4_22 = arith.constant 4 : index
    %42 = memref.load %arg0[%c4_22] : memref<16xi32, #tpu.memory_space<smem>>
    %c0_i32_23 = arith.constant 0 : i32
    %43 = arith.addi %c0_i32_23, %42 : i32
    %44 = arith.index_cast %43 : i32 to index
    %c0_24 = arith.constant 0 : index
    %45 = vector.load %arg1[%44, %c0_24] : memref<22x4xf32, #tpu.memory_space<vmem>>, vector<1x4xf32>
    %c12_25 = arith.constant 12 : index
    %46 = memref.load %arg0[%c12_25] : memref<16xi32, #tpu.memory_space<smem>>
    %c0_i32_26 = arith.constant 0 : i32
    %47 = arith.addi %c0_i32_26, %46 : i32
    %48 = arith.index_cast %47 : i32 to index
    %c0_27 = arith.constant 0 : index
    %49 = vector.load %arg1[%48, %c0_27] : memref<22x4xf32, #tpu.memory_space<vmem>>, vector<1x4xf32>
    %50 = tpu.concatenate %45, %49 in 0 : vector<1x4xf32>, vector<1x4xf32> -> vector<2x4xf32>
    %c5 = arith.constant 5 : index
    %51 = memref.load %arg0[%c5] : memref<16xi32, #tpu.memory_space<smem>>
    %c0_i32_28 = arith.constant 0 : i32
    %52 = arith.addi %c0_i32_28, %51 : i32
    %53 = arith.index_cast %52 : i32 to index
    %c0_29 = arith.constant 0 : index
    %54 = vector.load %arg1[%53, %c0_29] : memref<22x4xf32, #tpu.memory_space<vmem>>, vector<1x4xf32>
    %c13 = arith.constant 13 : index
    %55 = memref.load %arg0[%c13] : memref<16xi32, #tpu.memory_space<smem>>
    %c0_i32_30 = arith.constant 0 : i32
    %56 = arith.addi %c0_i32_30, %55 : i32
    %57 = arith.index_cast %56 : i32 to index
    %c0_31 = arith.constant 0 : index
    %58 = vector.load %arg1[%57, %c0_31] : memref<22x4xf32, #tpu.memory_space<vmem>>, vector<1x4xf32>
    %59 = tpu.concatenate %54, %58 in 0 : vector<1x4xf32>, vector<1x4xf32> -> vector<2x4xf32>
    %c6 = arith.constant 6 : index
    %60 = memref.load %arg0[%c6] : memref<16xi32, #tpu.memory_space<smem>>
    %c0_i32_32 = arith.constant 0 : i32
    %61 = arith.addi %c0_i32_32, %60 : i32
    %62 = arith.index_cast %61 : i32 to index
    %c0_33 = arith.constant 0 : index
    %63 = vector.load %arg1[%62, %c0_33] : memref<22x4xf32, #tpu.memory_space<vmem>>, vector<1x4xf32>
    %c14 = arith.constant 14 : index
    %64 = memref.load %arg0[%c14] : memref<16xi32, #tpu.memory_space<smem>>
    %c0_i32_34 = arith.constant 0 : i32
    %65 = arith.addi %c0_i32_34, %64 : i32
    %66 = arith.index_cast %65 : i32 to index
    %c0_35 = arith.constant 0 : index
    %67 = vector.load %arg1[%66, %c0_35] : memref<22x4xf32, #tpu.memory_space<vmem>>, vector<1x4xf32>
    %68 = tpu.concatenate %63, %67 in 0 : vector<1x4xf32>, vector<1x4xf32> -> vector<2x4xf32>
    %c7 = arith.constant 7 : index
    %69 = memref.load %arg0[%c7] : memref<16xi32, #tpu.memory_space<smem>>
    %c0_i32_36 = arith.constant 0 : i32
    %70 = arith.addi %c0_i32_36, %69 : i32
    %71 = arith.index_cast %70 : i32 to index
    %c0_37 = arith.constant 0 : index
    %72 = vector.load %arg1[%71, %c0_37] : memref<22x4xf32, #tpu.memory_space<vmem>>, vector<1x4xf32>
    %c15 = arith.constant 15 : index
    %73 = memref.load %arg0[%c15] : memref<16xi32, #tpu.memory_space<smem>>
    %c0_i32_38 = arith.constant 0 : i32
    %74 = arith.addi %c0_i32_38, %73 : i32
    %75 = arith.index_cast %74 : i32 to index
    %c0_39 = arith.constant 0 : index
    %76 = vector.load %arg1[%75, %c0_39] : memref<22x4xf32, #tpu.memory_space<vmem>>, vector<1x4xf32>
    %77 = tpu.concatenate %72, %76 in 0 : vector<1x4xf32>, vector<1x4xf32> -> vector<2x4xf32>
    %cst = arith.constant 0.000000e+00 : f32
    %78 = vector.broadcast %cst : f32 to vector<2x4xf32>
    %cst_40 = arith.constant 0.000000e+00 : f32
    %79 = vector.broadcast %cst_40 : f32 to vector<2x4xf32>
    %80 = vector.extract_strided_slice %78 {offsets = [0, 0], sizes = [2, 1], strides = [1, 1]} : vector<2x4xf32> to vector<2x1xf32>
    %81 = vector.extract_strided_slice %0 {offsets = [0, 0], sizes = [1, 4], strides = [1, 1]} : vector<4x4xf32> to vector<1x4xf32>
    %82 = vector.broadcast %80 : vector<2x1xf32> to vector<2x4xf32>
    %83 = vector.broadcast %81 : vector<1x4xf32> to vector<2x4xf32>
    %84 = arith.mulf %82, %83 : vector<2x4xf32>
    %85 = vector.extract_strided_slice %78 {offsets = [0, 1], sizes = [2, 1], strides = [1, 1]} : vector<2x4xf32> to vector<2x1xf32>
    %86 = vector.extract_strided_slice %0 {offsets = [1, 0], sizes = [1, 4], strides = [1, 1]} : vector<4x4xf32> to vector<1x4xf32>
    %87 = vector.broadcast %85 : vector<2x1xf32> to vector<2x4xf32>
    %88 = vector.broadcast %86 : vector<1x4xf32> to vector<2x4xf32>
    %89 = arith.mulf %87, %88 : vector<2x4xf32>
    %90 = arith.addf %84, %89 : vector<2x4xf32>
    %91 = vector.extract_strided_slice %78 {offsets = [0, 2], sizes = [2, 1], strides = [1, 1]} : vector<2x4xf32> to vector<2x1xf32>
    %92 = vector.extract_strided_slice %0 {offsets = [2, 0], sizes = [1, 4], strides = [1, 1]} : vector<4x4xf32> to vector<1x4xf32>
    %93 = vector.broadcast %91 : vector<2x1xf32> to vector<2x4xf32>
    %94 = vector.broadcast %92 : vector<1x4xf32> to vector<2x4xf32>
    %95 = arith.mulf %93, %94 : vector<2x4xf32>
    %96 = arith.addf %90, %95 : vector<2x4xf32>
    %97 = vector.extract_strided_slice %78 {offsets = [0, 3], sizes = [2, 1], strides = [1, 1]} : vector<2x4xf32> to vector<2x1xf32>
    %98 = vector.extract_strided_slice %0 {offsets = [3, 0], sizes = [1, 4], strides = [1, 1]} : vector<4x4xf32> to vector<1x4xf32>
    %99 = vector.broadcast %97 : vector<2x1xf32> to vector<2x4xf32>
    %100 = vector.broadcast %98 : vector<1x4xf32> to vector<2x4xf32>
    %101 = arith.mulf %99, %100 : vector<2x4xf32>
    %102 = arith.addf %96, %101 : vector<2x4xf32>
    %103 = vector.extract_strided_slice %79 {offsets = [0, 0], sizes = [2, 1], strides = [1, 1]} : vector<2x4xf32> to vector<2x1xf32>
    %104 = vector.extract_strided_slice %2 {offsets = [0, 0], sizes = [1, 4], strides = [1, 1]} : vector<4x4xf32> to vector<1x4xf32>
    %105 = vector.broadcast %103 : vector<2x1xf32> to vector<2x4xf32>
    %106 = vector.broadcast %104 : vector<1x4xf32> to vector<2x4xf32>
    %107 = arith.mulf %105, %106 : vector<2x4xf32>
    %108 = vector.broadcast %3 : vector<1x4xf32> to vector<2x4xf32>
    %109 = arith.addf %108, %107 : vector<2x4xf32>
    %110 = vector.extract_strided_slice %79 {offsets = [0, 1], sizes = [2, 1], strides = [1, 1]} : vector<2x4xf32> to vector<2x1xf32>
    %111 = vector.extract_strided_slice %2 {offsets = [1, 0], sizes = [1, 4], strides = [1, 1]} : vector<4x4xf32> to vector<1x4xf32>
    %112 = vector.broadcast %110 : vector<2x1xf32> to vector<2x4xf32>
    %113 = vector.broadcast %111 : vector<1x4xf32> to vector<2x4xf32>
    %114 = arith.mulf %112, %113 : vector<2x4xf32>
    %115 = arith.addf %109, %114 : vector<2x4xf32>
    %116 = vector.extract_strided_slice %79 {offsets = [0, 2], sizes = [2, 1], strides = [1, 1]} : vector<2x4xf32> to vector<2x1xf32>
    %117 = vector.extract_strided_slice %2 {offsets = [2, 0], sizes = [1, 4], strides = [1, 1]} : vector<4x4xf32> to vector<1x4xf32>
    %118 = vector.broadcast %116 : vector<2x1xf32> to vector<2x4xf32>
    %119 = vector.broadcast %117 : vector<1x4xf32> to vector<2x4xf32>
    %120 = arith.mulf %118, %119 : vector<2x4xf32>
    %121 = arith.addf %115, %120 : vector<2x4xf32>
    %122 = vector.extract_strided_slice %79 {offsets = [0, 3], sizes = [2, 1], strides = [1, 1]} : vector<2x4xf32> to vector<2x1xf32>
    %123 = vector.extract_strided_slice %2 {offsets = [3, 0], sizes = [1, 4], strides = [1, 1]} : vector<4x4xf32> to vector<1x4xf32>
    %124 = vector.broadcast %122 : vector<2x1xf32> to vector<2x4xf32>
    %125 = vector.broadcast %123 : vector<1x4xf32> to vector<2x4xf32>
    %126 = arith.mulf %124, %125 : vector<2x4xf32>
    %127 = arith.addf %121, %126 : vector<2x4xf32>
    %128 = arith.addf %14, %102 : vector<2x4xf32>
    %129 = math.tanh %128 : vector<2x4xf32>
    %130 = vector.extract_strided_slice %129 {offsets = [0, 0], sizes = [2, 1], strides = [1, 1]} : vector<2x4xf32> to vector<2x1xf32>
    %131 = vector.extract_strided_slice %1 {offsets = [0, 0], sizes = [1, 4], strides = [1, 1]} : vector<4x4xf32> to vector<1x4xf32>
    %132 = vector.broadcast %130 : vector<2x1xf32> to vector<2x4xf32>
    %133 = vector.broadcast %131 : vector<1x4xf32> to vector<2x4xf32>
    %134 = arith.mulf %132, %133 : vector<2x4xf32>
    %135 = arith.addf %127, %134 : vector<2x4xf32>
    %136 = vector.extract_strided_slice %129 {offsets = [0, 1], sizes = [2, 1], strides = [1, 1]} : vector<2x4xf32> to vector<2x1xf32>
    %137 = vector.extract_strided_slice %1 {offsets = [1, 0], sizes = [1, 4], strides = [1, 1]} : vector<4x4xf32> to vector<1x4xf32>
    %138 = vector.broadcast %136 : vector<2x1xf32> to vector<2x4xf32>
    %139 = vector.broadcast %137 : vector<1x4xf32> to vector<2x4xf32>
    %140 = arith.mulf %138, %139 : vector<2x4xf32>
    %141 = arith.addf %135, %140 : vector<2x4xf32>
    %142 = vector.extract_strided_slice %129 {offsets = [0, 2], sizes = [2, 1], strides = [1, 1]} : vector<2x4xf32> to vector<2x1xf32>
    %143 = vector.extract_strided_slice %1 {offsets = [2, 0], sizes = [1, 4], strides = [1, 1]} : vector<4x4xf32> to vector<1x4xf32>
    %144 = vector.broadcast %142 : vector<2x1xf32> to vector<2x4xf32>
    %145 = vector.broadcast %143 : vector<1x4xf32> to vector<2x4xf32>
    %146 = arith.mulf %144, %145 : vector<2x4xf32>
    %147 = arith.addf %141, %146 : vector<2x4xf32>
    %148 = vector.extract_strided_slice %129 {offsets = [0, 3], sizes = [2, 1], strides = [1, 1]} : vector<2x4xf32> to vector<2x1xf32>
    %149 = vector.extract_strided_slice %1 {offsets = [3, 0], sizes = [1, 4], strides = [1, 1]} : vector<4x4xf32> to vector<1x4xf32>
    %150 = vector.broadcast %148 : vector<2x1xf32> to vector<2x4xf32>
    %151 = vector.broadcast %149 : vector<1x4xf32> to vector<2x4xf32>
    %152 = arith.mulf %150, %151 : vector<2x4xf32>
    %153 = arith.addf %147, %152 : vector<2x4xf32>
    %154 = math.tanh %153 : vector<2x4xf32>
    %155 = vector.extract_strided_slice %129 {offsets = [0, 0], sizes = [2, 1], strides = [1, 1]} : vector<2x4xf32> to vector<2x1xf32>
    %156 = vector.extract_strided_slice %0 {offsets = [0, 0], sizes = [1, 4], strides = [1, 1]} : vector<4x4xf32> to vector<1x4xf32>
    %157 = vector.broadcast %155 : vector<2x1xf32> to vector<2x4xf32>
    %158 = vector.broadcast %156 : vector<1x4xf32> to vector<2x4xf32>
    %159 = arith.mulf %157, %158 : vector<2x4xf32>
    %160 = vector.extract_strided_slice %129 {offsets = [0, 1], sizes = [2, 1], strides = [1, 1]} : vector<2x4xf32> to vector<2x1xf32>
    %161 = vector.extract_strided_slice %0 {offsets = [1, 0], sizes = [1, 4], strides = [1, 1]} : vector<4x4xf32> to vector<1x4xf32>
    %162 = vector.broadcast %160 : vector<2x1xf32> to vector<2x4xf32>
    %163 = vector.broadcast %161 : vector<1x4xf32> to vector<2x4xf32>
    %164 = arith.mulf %162, %163 : vector<2x4xf32>
    %165 = arith.addf %159, %164 : vector<2x4xf32>
    %166 = vector.extract_strided_slice %129 {offsets = [0, 2], sizes = [2, 1], strides = [1, 1]} : vector<2x4xf32> to vector<2x1xf32>
    %167 = vector.extract_strided_slice %0 {offsets = [2, 0], sizes = [1, 4], strides = [1, 1]} : vector<4x4xf32> to vector<1x4xf32>
    %168 = vector.broadcast %166 : vector<2x1xf32> to vector<2x4xf32>
    %169 = vector.broadcast %167 : vector<1x4xf32> to vector<2x4xf32>
    %170 = arith.mulf %168, %169 : vector<2x4xf32>
    %171 = arith.addf %165, %170 : vector<2x4xf32>
    %172 = vector.extract_strided_slice %129 {offsets = [0, 3], sizes = [2, 1], strides = [1, 1]} : vector<2x4xf32> to vector<2x1xf32>
    %173 = vector.extract_strided_slice %0 {offsets = [3, 0], sizes = [1, 4], strides = [1, 1]} : vector<4x4xf32> to vector<1x4xf32>
    %174 = vector.broadcast %172 : vector<2x1xf32> to vector<2x4xf32>
    %175 = vector.broadcast %173 : vector<1x4xf32> to vector<2x4xf32>
    %176 = arith.mulf %174, %175 : vector<2x4xf32>
    %177 = arith.addf %171, %176 : vector<2x4xf32>
    %178 = vector.extract_strided_slice %154 {offsets = [0, 0], sizes = [2, 1], strides = [1, 1]} : vector<2x4xf32> to vector<2x1xf32>
    %179 = vector.extract_strided_slice %2 {offsets = [0, 0], sizes = [1, 4], strides = [1, 1]} : vector<4x4xf32> to vector<1x4xf32>
    %180 = vector.broadcast %178 : vector<2x1xf32> to vector<2x4xf32>
    %181 = vector.broadcast %179 : vector<1x4xf32> to vector<2x4xf32>
    %182 = arith.mulf %180, %181 : vector<2x4xf32>
    %183 = vector.broadcast %3 : vector<1x4xf32> to vector<2x4xf32>
    %184 = arith.addf %183, %182 : vector<2x4xf32>
    %185 = vector.extract_strided_slice %154 {offsets = [0, 1], sizes = [2, 1], strides = [1, 1]} : vector<2x4xf32> to vector<2x1xf32>
    %186 = vector.extract_strided_slice %2 {offsets = [1, 0], sizes = [1, 4], strides = [1, 1]} : vector<4x4xf32> to vector<1x4xf32>
    %187 = vector.broadcast %185 : vector<2x1xf32> to vector<2x4xf32>
    %188 = vector.broadcast %186 : vector<1x4xf32> to vector<2x4xf32>
    %189 = arith.mulf %187, %188 : vector<2x4xf32>
    %190 = arith.addf %184, %189 : vector<2x4xf32>
    %191 = vector.extract_strided_slice %154 {offsets = [0, 2], sizes = [2, 1], strides = [1, 1]} : vector<2x4xf32> to vector<2x1xf32>
    %192 = vector.extract_strided_slice %2 {offsets = [2, 0], sizes = [1, 4], strides = [1, 1]} : vector<4x4xf32> to vector<1x4xf32>
    %193 = vector.broadcast %191 : vector<2x1xf32> to vector<2x4xf32>
    %194 = vector.broadcast %192 : vector<1x4xf32> to vector<2x4xf32>
    %195 = arith.mulf %193, %194 : vector<2x4xf32>
    %196 = arith.addf %190, %195 : vector<2x4xf32>
    %197 = vector.extract_strided_slice %154 {offsets = [0, 3], sizes = [2, 1], strides = [1, 1]} : vector<2x4xf32> to vector<2x1xf32>
    %198 = vector.extract_strided_slice %2 {offsets = [3, 0], sizes = [1, 4], strides = [1, 1]} : vector<4x4xf32> to vector<1x4xf32>
    %199 = vector.broadcast %197 : vector<2x1xf32> to vector<2x4xf32>
    %200 = vector.broadcast %198 : vector<1x4xf32> to vector<2x4xf32>
    %201 = arith.mulf %199, %200 : vector<2x4xf32>
    %202 = arith.addf %196, %201 : vector<2x4xf32>
    %203 = arith.addf %23, %177 : vector<2x4xf32>
    %204 = math.tanh %203 : vector<2x4xf32>
    %205 = vector.extract_strided_slice %204 {offsets = [0, 0], sizes = [2, 1], strides = [1, 1]} : vector<2x4xf32> to vector<2x1xf32>
    %206 = vector.extract_strided_slice %1 {offsets = [0, 0], sizes = [1, 4], strides = [1, 1]} : vector<4x4xf32> to vector<1x4xf32>
    %207 = vector.broadcast %205 : vector<2x1xf32> to vector<2x4xf32>
    %208 = vector.broadcast %206 : vector<1x4xf32> to vector<2x4xf32>
    %209 = arith.mulf %207, %208 : vector<2x4xf32>
    %210 = arith.addf %202, %209 : vector<2x4xf32>
    %211 = vector.extract_strided_slice %204 {offsets = [0, 1], sizes = [2, 1], strides = [1, 1]} : vector<2x4xf32> to vector<2x1xf32>
    %212 = vector.extract_strided_slice %1 {offsets = [1, 0], sizes = [1, 4], strides = [1, 1]} : vector<4x4xf32> to vector<1x4xf32>
    %213 = vector.broadcast %211 : vector<2x1xf32> to vector<2x4xf32>
    %214 = vector.broadcast %212 : vector<1x4xf32> to vector<2x4xf32>
    %215 = arith.mulf %213, %214 : vector<2x4xf32>
    %216 = arith.addf %210, %215 : vector<2x4xf32>
    %217 = vector.extract_strided_slice %204 {offsets = [0, 2], sizes = [2, 1], strides = [1, 1]} : vector<2x4xf32> to vector<2x1xf32>
    %218 = vector.extract_strided_slice %1 {offsets = [2, 0], sizes = [1, 4], strides = [1, 1]} : vector<4x4xf32> to vector<1x4xf32>
    %219 = vector.broadcast %217 : vector<2x1xf32> to vector<2x4xf32>
    %220 = vector.broadcast %218 : vector<1x4xf32> to vector<2x4xf32>
    %221 = arith.mulf %219, %220 : vector<2x4xf32>
    %222 = arith.addf %216, %221 : vector<2x4xf32>
    %223 = vector.extract_strided_slice %204 {offsets = [0, 3], sizes = [2, 1], strides = [1, 1]} : vector<2x4xf32> to vector<2x1xf32>
    %224 = vector.extract_strided_slice %1 {offsets = [3, 0], sizes = [1, 4], strides = [1, 1]} : vector<4x4xf32> to vector<1x4xf32>
    %225 = vector.broadcast %223 : vector<2x1xf32> to vector<2x4xf32>
    %226 = vector.broadcast %224 : vector<1x4xf32> to vector<2x4xf32>
    %227 = arith.mulf %225, %226 : vector<2x4xf32>
    %228 = arith.addf %222, %227 : vector<2x4xf32>
    %229 = math.tanh %228 : vector<2x4xf32>
    %230 = vector.extract_strided_slice %204 {offsets = [0, 0], sizes = [2, 1], strides = [1, 1]} : vector<2x4xf32> to vector<2x1xf32>
    %231 = vector.extract_strided_slice %0 {offsets = [0, 0], sizes = [1, 4], strides = [1, 1]} : vector<4x4xf32> to vector<1x4xf32>
    %232 = vector.broadcast %230 : vector<2x1xf32> to vector<2x4xf32>
    %233 = vector.broadcast %231 : vector<1x4xf32> to vector<2x4xf32>
    %234 = arith.mulf %232, %233 : vector<2x4xf32>
    %235 = vector.extract_strided_slice %204 {offsets = [0, 1], sizes = [2, 1], strides = [1, 1]} : vector<2x4xf32> to vector<2x1xf32>
    %236 = vector.extract_strided_slice %0 {offsets = [1, 0], sizes = [1, 4], strides = [1, 1]} : vector<4x4xf32> to vector<1x4xf32>
    %237 = vector.broadcast %235 : vector<2x1xf32> to vector<2x4xf32>
    %238 = vector.broadcast %236 : vector<1x4xf32> to vector<2x4xf32>
    %239 = arith.mulf %237, %238 : vector<2x4xf32>
    %240 = arith.addf %234, %239 : vector<2x4xf32>
    %241 = vector.extract_strided_slice %204 {offsets = [0, 2], sizes = [2, 1], strides = [1, 1]} : vector<2x4xf32> to vector<2x1xf32>
    %242 = vector.extract_strided_slice %0 {offsets = [2, 0], sizes = [1, 4], strides = [1, 1]} : vector<4x4xf32> to vector<1x4xf32>
    %243 = vector.broadcast %241 : vector<2x1xf32> to vector<2x4xf32>
    %244 = vector.broadcast %242 : vector<1x4xf32> to vector<2x4xf32>
    %245 = arith.mulf %243, %244 : vector<2x4xf32>
    %246 = arith.addf %240, %245 : vector<2x4xf32>
    %247 = vector.extract_strided_slice %204 {offsets = [0, 3], sizes = [2, 1], strides = [1, 1]} : vector<2x4xf32> to vector<2x1xf32>
    %248 = vector.extract_strided_slice %0 {offsets = [3, 0], sizes = [1, 4], strides = [1, 1]} : vector<4x4xf32> to vector<1x4xf32>
    %249 = vector.broadcast %247 : vector<2x1xf32> to vector<2x4xf32>
    %250 = vector.broadcast %248 : vector<1x4xf32> to vector<2x4xf32>
    %251 = arith.mulf %249, %250 : vector<2x4xf32>
    %252 = arith.addf %246, %251 : vector<2x4xf32>
    %253 = vector.extract_strided_slice %229 {offsets = [0, 0], sizes = [2, 1], strides = [1, 1]} : vector<2x4xf32> to vector<2x1xf32>
    %254 = vector.extract_strided_slice %2 {offsets = [0, 0], sizes = [1, 4], strides = [1, 1]} : vector<4x4xf32> to vector<1x4xf32>
    %255 = vector.broadcast %253 : vector<2x1xf32> to vector<2x4xf32>
    %256 = vector.broadcast %254 : vector<1x4xf32> to vector<2x4xf32>
    %257 = arith.mulf %255, %256 : vector<2x4xf32>
    %258 = vector.broadcast %3 : vector<1x4xf32> to vector<2x4xf32>
    %259 = arith.addf %258, %257 : vector<2x4xf32>
    %260 = vector.extract_strided_slice %229 {offsets = [0, 1], sizes = [2, 1], strides = [1, 1]} : vector<2x4xf32> to vector<2x1xf32>
    %261 = vector.extract_strided_slice %2 {offsets = [1, 0], sizes = [1, 4], strides = [1, 1]} : vector<4x4xf32> to vector<1x4xf32>
    %262 = vector.broadcast %260 : vector<2x1xf32> to vector<2x4xf32>
    %263 = vector.broadcast %261 : vector<1x4xf32> to vector<2x4xf32>
    %264 = arith.mulf %262, %263 : vector<2x4xf32>
    %265 = arith.addf %259, %264 : vector<2x4xf32>
    %266 = vector.extract_strided_slice %229 {offsets = [0, 2], sizes = [2, 1], strides = [1, 1]} : vector<2x4xf32> to vector<2x1xf32>
    %267 = vector.extract_strided_slice %2 {offsets = [2, 0], sizes = [1, 4], strides = [1, 1]} : vector<4x4xf32> to vector<1x4xf32>
    %268 = vector.broadcast %266 : vector<2x1xf32> to vector<2x4xf32>
    %269 = vector.broadcast %267 : vector<1x4xf32> to vector<2x4xf32>
    %270 = arith.mulf %268, %269 : vector<2x4xf32>
    %271 = arith.addf %265, %270 : vector<2x4xf32>
    %272 = vector.extract_strided_slice %229 {offsets = [0, 3], sizes = [2, 1], strides = [1, 1]} : vector<2x4xf32> to vector<2x1xf32>
    %273 = vector.extract_strided_slice %2 {offsets = [3, 0], sizes = [1, 4], strides = [1, 1]} : vector<4x4xf32> to vector<1x4xf32>
    %274 = vector.broadcast %272 : vector<2x1xf32> to vector<2x4xf32>
    %275 = vector.broadcast %273 : vector<1x4xf32> to vector<2x4xf32>
    %276 = arith.mulf %274, %275 : vector<2x4xf32>
    %277 = arith.addf %271, %276 : vector<2x4xf32>
    %278 = arith.addf %32, %252 : vector<2x4xf32>
    %279 = math.tanh %278 : vector<2x4xf32>
    %280 = vector.extract_strided_slice %279 {offsets = [0, 0], sizes = [2, 1], strides = [1, 1]} : vector<2x4xf32> to vector<2x1xf32>
    %281 = vector.extract_strided_slice %1 {offsets = [0, 0], sizes = [1, 4], strides = [1, 1]} : vector<4x4xf32> to vector<1x4xf32>
    %282 = vector.broadcast %280 : vector<2x1xf32> to vector<2x4xf32>
    %283 = vector.broadcast %281 : vector<1x4xf32> to vector<2x4xf32>
    %284 = arith.mulf %282, %283 : vector<2x4xf32>
    %285 = arith.addf %277, %284 : vector<2x4xf32>
    %286 = vector.extract_strided_slice %279 {offsets = [0, 1], sizes = [2, 1], strides = [1, 1]} : vector<2x4xf32> to vector<2x1xf32>
    %287 = vector.extract_strided_slice %1 {offsets = [1, 0], sizes = [1, 4], strides = [1, 1]} : vector<4x4xf32> to vector<1x4xf32>
    %288 = vector.broadcast %286 : vector<2x1xf32> to vector<2x4xf32>
    %289 = vector.broadcast %287 : vector<1x4xf32> to vector<2x4xf32>
    %290 = arith.mulf %288, %289 : vector<2x4xf32>
    %291 = arith.addf %285, %290 : vector<2x4xf32>
    %292 = vector.extract_strided_slice %279 {offsets = [0, 2], sizes = [2, 1], strides = [1, 1]} : vector<2x4xf32> to vector<2x1xf32>
    %293 = vector.extract_strided_slice %1 {offsets = [2, 0], sizes = [1, 4], strides = [1, 1]} : vector<4x4xf32> to vector<1x4xf32>
    %294 = vector.broadcast %292 : vector<2x1xf32> to vector<2x4xf32>
    %295 = vector.broadcast %293 : vector<1x4xf32> to vector<2x4xf32>
    %296 = arith.mulf %294, %295 : vector<2x4xf32>
    %297 = arith.addf %291, %296 : vector<2x4xf32>
    %298 = vector.extract_strided_slice %279 {offsets = [0, 3], sizes = [2, 1], strides = [1, 1]} : vector<2x4xf32> to vector<2x1xf32>
    %299 = vector.extract_strided_slice %1 {offsets = [3, 0], sizes = [1, 4], strides = [1, 1]} : vector<4x4xf32> to vector<1x4xf32>
    %300 = vector.broadcast %298 : vector<2x1xf32> to vector<2x4xf32>
    %301 = vector.broadcast %299 : vector<1x4xf32> to vector<2x4xf32>
    %302 = arith.mulf %300, %301 : vector<2x4xf32>
    %303 = arith.addf %297, %302 : vector<2x4xf32>
    %304 = math.tanh %303 : vector<2x4xf32>
    %305 = vector.extract_strided_slice %279 {offsets = [0, 0], sizes = [2, 1], strides = [1, 1]} : vector<2x4xf32> to vector<2x1xf32>
    %306 = vector.extract_strided_slice %0 {offsets = [0, 0], sizes = [1, 4], strides = [1, 1]} : vector<4x4xf32> to vector<1x4xf32>
    %307 = vector.broadcast %305 : vector<2x1xf32> to vector<2x4xf32>
    %308 = vector.broadcast %306 : vector<1x4xf32> to vector<2x4xf32>
    %309 = arith.mulf %307, %308 : vector<2x4xf32>
    %310 = vector.extract_strided_slice %279 {offsets = [0, 1], sizes = [2, 1], strides = [1, 1]} : vector<2x4xf32> to vector<2x1xf32>
    %311 = vector.extract_strided_slice %0 {offsets = [1, 0], sizes = [1, 4], strides = [1, 1]} : vector<4x4xf32> to vector<1x4xf32>
    %312 = vector.broadcast %310 : vector<2x1xf32> to vector<2x4xf32>
    %313 = vector.broadcast %311 : vector<1x4xf32> to vector<2x4xf32>
    %314 = arith.mulf %312, %313 : vector<2x4xf32>
    %315 = arith.addf %309, %314 : vector<2x4xf32>
    %316 = vector.extract_strided_slice %279 {offsets = [0, 2], sizes = [2, 1], strides = [1, 1]} : vector<2x4xf32> to vector<2x1xf32>
    %317 = vector.extract_strided_slice %0 {offsets = [2, 0], sizes = [1, 4], strides = [1, 1]} : vector<4x4xf32> to vector<1x4xf32>
    %318 = vector.broadcast %316 : vector<2x1xf32> to vector<2x4xf32>
    %319 = vector.broadcast %317 : vector<1x4xf32> to vector<2x4xf32>
    %320 = arith.mulf %318, %319 : vector<2x4xf32>
    %321 = arith.addf %315, %320 : vector<2x4xf32>
    %322 = vector.extract_strided_slice %279 {offsets = [0, 3], sizes = [2, 1], strides = [1, 1]} : vector<2x4xf32> to vector<2x1xf32>
    %323 = vector.extract_strided_slice %0 {offsets = [3, 0], sizes = [1, 4], strides = [1, 1]} : vector<4x4xf32> to vector<1x4xf32>
    %324 = vector.broadcast %322 : vector<2x1xf32> to vector<2x4xf32>
    %325 = vector.broadcast %323 : vector<1x4xf32> to vector<2x4xf32>
    %326 = arith.mulf %324, %325 : vector<2x4xf32>
    %327 = arith.addf %321, %326 : vector<2x4xf32>
    %328 = vector.extract_strided_slice %304 {offsets = [0, 0], sizes = [2, 1], strides = [1, 1]} : vector<2x4xf32> to vector<2x1xf32>
    %329 = vector.extract_strided_slice %2 {offsets = [0, 0], sizes = [1, 4], strides = [1, 1]} : vector<4x4xf32> to vector<1x4xf32>
    %330 = vector.broadcast %328 : vector<2x1xf32> to vector<2x4xf32>
    %331 = vector.broadcast %329 : vector<1x4xf32> to vector<2x4xf32>
    %332 = arith.mulf %330, %331 : vector<2x4xf32>
    %333 = vector.broadcast %3 : vector<1x4xf32> to vector<2x4xf32>
    %334 = arith.addf %333, %332 : vector<2x4xf32>
    %335 = vector.extract_strided_slice %304 {offsets = [0, 1], sizes = [2, 1], strides = [1, 1]} : vector<2x4xf32> to vector<2x1xf32>
    %336 = vector.extract_strided_slice %2 {offsets = [1, 0], sizes = [1, 4], strides = [1, 1]} : vector<4x4xf32> to vector<1x4xf32>
    %337 = vector.broadcast %335 : vector<2x1xf32> to vector<2x4xf32>
    %338 = vector.broadcast %336 : vector<1x4xf32> to vector<2x4xf32>
    %339 = arith.mulf %337, %338 : vector<2x4xf32>
    %340 = arith.addf %334, %339 : vector<2x4xf32>
    %341 = vector.extract_strided_slice %304 {offsets = [0, 2], sizes = [2, 1], strides = [1, 1]} : vector<2x4xf32> to vector<2x1xf32>
    %342 = vector.extract_strided_slice %2 {offsets = [2, 0], sizes = [1, 4], strides = [1, 1]} : vector<4x4xf32> to vector<1x4xf32>
    %343 = vector.broadcast %341 : vector<2x1xf32> to vector<2x4xf32>
    %344 = vector.broadcast %342 : vector<1x4xf32> to vector<2x4xf32>
    %345 = arith.mulf %343, %344 : vector<2x4xf32>
    %346 = arith.addf %340, %345 : vector<2x4xf32>
    %347 = vector.extract_strided_slice %304 {offsets = [0, 3], sizes = [2, 1], strides = [1, 1]} : vector<2x4xf32> to vector<2x1xf32>
    %348 = vector.extract_strided_slice %2 {offsets = [3, 0], sizes = [1, 4], strides = [1, 1]} : vector<4x4xf32> to vector<1x4xf32>
    %349 = vector.broadcast %347 : vector<2x1xf32> to vector<2x4xf32>
    %350 = vector.broadcast %348 : vector<1x4xf32> to vector<2x4xf32>
    %351 = arith.mulf %349, %350 : vector<2x4xf32>
    %352 = arith.addf %346, %351 : vector<2x4xf32>
    %353 = arith.addf %41, %327 : vector<2x4xf32>
    %354 = math.tanh %353 : vector<2x4xf32>
    %355 = vector.extract_strided_slice %354 {offsets = [0, 0], sizes = [2, 1], strides = [1, 1]} : vector<2x4xf32> to vector<2x1xf32>
    %356 = vector.extract_strided_slice %1 {offsets = [0, 0], sizes = [1, 4], strides = [1, 1]} : vector<4x4xf32> to vector<1x4xf32>
    %357 = vector.broadcast %355 : vector<2x1xf32> to vector<2x4xf32>
    %358 = vector.broadcast %356 : vector<1x4xf32> to vector<2x4xf32>
    %359 = arith.mulf %357, %358 : vector<2x4xf32>
    %360 = arith.addf %352, %359 : vector<2x4xf32>
    %361 = vector.extract_strided_slice %354 {offsets = [0, 1], sizes = [2, 1], strides = [1, 1]} : vector<2x4xf32> to vector<2x1xf32>
    %362 = vector.extract_strided_slice %1 {offsets = [1, 0], sizes = [1, 4], strides = [1, 1]} : vector<4x4xf32> to vector<1x4xf32>
    %363 = vector.broadcast %361 : vector<2x1xf32> to vector<2x4xf32>
    %364 = vector.broadcast %362 : vector<1x4xf32> to vector<2x4xf32>
    %365 = arith.mulf %363, %364 : vector<2x4xf32>
    %366 = arith.addf %360, %365 : vector<2x4xf32>
    %367 = vector.extract_strided_slice %354 {offsets = [0, 2], sizes = [2, 1], strides = [1, 1]} : vector<2x4xf32> to vector<2x1xf32>
    %368 = vector.extract_strided_slice %1 {offsets = [2, 0], sizes = [1, 4], strides = [1, 1]} : vector<4x4xf32> to vector<1x4xf32>
    %369 = vector.broadcast %367 : vector<2x1xf32> to vector<2x4xf32>
    %370 = vector.broadcast %368 : vector<1x4xf32> to vector<2x4xf32>
    %371 = arith.mulf %369, %370 : vector<2x4xf32>
    %372 = arith.addf %366, %371 : vector<2x4xf32>
    %373 = vector.extract_strided_slice %354 {offsets = [0, 3], sizes = [2, 1], strides = [1, 1]} : vector<2x4xf32> to vector<2x1xf32>
    %374 = vector.extract_strided_slice %1 {offsets = [3, 0], sizes = [1, 4], strides = [1, 1]} : vector<4x4xf32> to vector<1x4xf32>
    %375 = vector.broadcast %373 : vector<2x1xf32> to vector<2x4xf32>
    %376 = vector.broadcast %374 : vector<1x4xf32> to vector<2x4xf32>
    %377 = arith.mulf %375, %376 : vector<2x4xf32>
    %378 = arith.addf %372, %377 : vector<2x4xf32>
    %379 = math.tanh %378 : vector<2x4xf32>
    %380 = vector.extract_strided_slice %354 {offsets = [0, 0], sizes = [2, 1], strides = [1, 1]} : vector<2x4xf32> to vector<2x1xf32>
    %381 = vector.extract_strided_slice %0 {offsets = [0, 0], sizes = [1, 4], strides = [1, 1]} : vector<4x4xf32> to vector<1x4xf32>
    %382 = vector.broadcast %380 : vector<2x1xf32> to vector<2x4xf32>
    %383 = vector.broadcast %381 : vector<1x4xf32> to vector<2x4xf32>
    %384 = arith.mulf %382, %383 : vector<2x4xf32>
    %385 = vector.extract_strided_slice %354 {offsets = [0, 1], sizes = [2, 1], strides = [1, 1]} : vector<2x4xf32> to vector<2x1xf32>
    %386 = vector.extract_strided_slice %0 {offsets = [1, 0], sizes = [1, 4], strides = [1, 1]} : vector<4x4xf32> to vector<1x4xf32>
    %387 = vector.broadcast %385 : vector<2x1xf32> to vector<2x4xf32>
    %388 = vector.broadcast %386 : vector<1x4xf32> to vector<2x4xf32>
    %389 = arith.mulf %387, %388 : vector<2x4xf32>
    %390 = arith.addf %384, %389 : vector<2x4xf32>
    %391 = vector.extract_strided_slice %354 {offsets = [0, 2], sizes = [2, 1], strides = [1, 1]} : vector<2x4xf32> to vector<2x1xf32>
    %392 = vector.extract_strided_slice %0 {offsets = [2, 0], sizes = [1, 4], strides = [1, 1]} : vector<4x4xf32> to vector<1x4xf32>
    %393 = vector.broadcast %391 : vector<2x1xf32> to vector<2x4xf32>
    %394 = vector.broadcast %392 : vector<1x4xf32> to vector<2x4xf32>
    %395 = arith.mulf %393, %394 : vector<2x4xf32>
    %396 = arith.addf %390, %395 : vector<2x4xf32>
    %397 = vector.extract_strided_slice %354 {offsets = [0, 3], sizes = [2, 1], strides = [1, 1]} : vector<2x4xf32> to vector<2x1xf32>
    %398 = vector.extract_strided_slice %0 {offsets = [3, 0], sizes = [1, 4], strides = [1, 1]} : vector<4x4xf32> to vector<1x4xf32>
    %399 = vector.broadcast %397 : vector<2x1xf32> to vector<2x4xf32>
    %400 = vector.broadcast %398 : vector<1x4xf32> to vector<2x4xf32>
    %401 = arith.mulf %399, %400 : vector<2x4xf32>
    %402 = arith.addf %396, %401 : vector<2x4xf32>
    %403 = vector.extract_strided_slice %379 {offsets = [0, 0], sizes = [2, 1], strides = [1, 1]} : vector<2x4xf32> to vector<2x1xf32>
    %404 = vector.extract_strided_slice %2 {offsets = [0, 0], sizes = [1, 4], strides = [1, 1]} : vector<4x4xf32> to vector<1x4xf32>
    %405 = vector.broadcast %403 : vector<2x1xf32> to vector<2x4xf32>
    %406 = vector.broadcast %404 : vector<1x4xf32> to vector<2x4xf32>
    %407 = arith.mulf %405, %406 : vector<2x4xf32>
    %408 = vector.broadcast %3 : vector<1x4xf32> to vector<2x4xf32>
    %409 = arith.addf %408, %407 : vector<2x4xf32>
    %410 = vector.extract_strided_slice %379 {offsets = [0, 1], sizes = [2, 1], strides = [1, 1]} : vector<2x4xf32> to vector<2x1xf32>
    %411 = vector.extract_strided_slice %2 {offsets = [1, 0], sizes = [1, 4], strides = [1, 1]} : vector<4x4xf32> to vector<1x4xf32>
    %412 = vector.broadcast %410 : vector<2x1xf32> to vector<2x4xf32>
    %413 = vector.broadcast %411 : vector<1x4xf32> to vector<2x4xf32>
    %414 = arith.mulf %412, %413 : vector<2x4xf32>
    %415 = arith.addf %409, %414 : vector<2x4xf32>
    %416 = vector.extract_strided_slice %379 {offsets = [0, 2], sizes = [2, 1], strides = [1, 1]} : vector<2x4xf32> to vector<2x1xf32>
    %417 = vector.extract_strided_slice %2 {offsets = [2, 0], sizes = [1, 4], strides = [1, 1]} : vector<4x4xf32> to vector<1x4xf32>
    %418 = vector.broadcast %416 : vector<2x1xf32> to vector<2x4xf32>
    %419 = vector.broadcast %417 : vector<1x4xf32> to vector<2x4xf32>
    %420 = arith.mulf %418, %419 : vector<2x4xf32>
    %421 = arith.addf %415, %420 : vector<2x4xf32>
    %422 = vector.extract_strided_slice %379 {offsets = [0, 3], sizes = [2, 1], strides = [1, 1]} : vector<2x4xf32> to vector<2x1xf32>
    %423 = vector.extract_strided_slice %2 {offsets = [3, 0], sizes = [1, 4], strides = [1, 1]} : vector<4x4xf32> to vector<1x4xf32>
    %424 = vector.broadcast %422 : vector<2x1xf32> to vector<2x4xf32>
    %425 = vector.broadcast %423 : vector<1x4xf32> to vector<2x4xf32>
    %426 = arith.mulf %424, %425 : vector<2x4xf32>
    %427 = arith.addf %421, %426 : vector<2x4xf32>
    %428 = arith.addf %50, %402 : vector<2x4xf32>
    %429 = math.tanh %428 : vector<2x4xf32>
    %430 = vector.extract_strided_slice %429 {offsets = [0, 0], sizes = [2, 1], strides = [1, 1]} : vector<2x4xf32> to vector<2x1xf32>
    %431 = vector.extract_strided_slice %1 {offsets = [0, 0], sizes = [1, 4], strides = [1, 1]} : vector<4x4xf32> to vector<1x4xf32>
    %432 = vector.broadcast %430 : vector<2x1xf32> to vector<2x4xf32>
    %433 = vector.broadcast %431 : vector<1x4xf32> to vector<2x4xf32>
    %434 = arith.mulf %432, %433 : vector<2x4xf32>
    %435 = arith.addf %427, %434 : vector<2x4xf32>
    %436 = vector.extract_strided_slice %429 {offsets = [0, 1], sizes = [2, 1], strides = [1, 1]} : vector<2x4xf32> to vector<2x1xf32>
    %437 = vector.extract_strided_slice %1 {offsets = [1, 0], sizes = [1, 4], strides = [1, 1]} : vector<4x4xf32> to vector<1x4xf32>
    %438 = vector.broadcast %436 : vector<2x1xf32> to vector<2x4xf32>
    %439 = vector.broadcast %437 : vector<1x4xf32> to vector<2x4xf32>
    %440 = arith.mulf %438, %439 : vector<2x4xf32>
    %441 = arith.addf %435, %440 : vector<2x4xf32>
    %442 = vector.extract_strided_slice %429 {offsets = [0, 2], sizes = [2, 1], strides = [1, 1]} : vector<2x4xf32> to vector<2x1xf32>
    %443 = vector.extract_strided_slice %1 {offsets = [2, 0], sizes = [1, 4], strides = [1, 1]} : vector<4x4xf32> to vector<1x4xf32>
    %444 = vector.broadcast %442 : vector<2x1xf32> to vector<2x4xf32>
    %445 = vector.broadcast %443 : vector<1x4xf32> to vector<2x4xf32>
    %446 = arith.mulf %444, %445 : vector<2x4xf32>
    %447 = arith.addf %441, %446 : vector<2x4xf32>
    %448 = vector.extract_strided_slice %429 {offsets = [0, 3], sizes = [2, 1], strides = [1, 1]} : vector<2x4xf32> to vector<2x1xf32>
    %449 = vector.extract_strided_slice %1 {offsets = [3, 0], sizes = [1, 4], strides = [1, 1]} : vector<4x4xf32> to vector<1x4xf32>
    %450 = vector.broadcast %448 : vector<2x1xf32> to vector<2x4xf32>
    %451 = vector.broadcast %449 : vector<1x4xf32> to vector<2x4xf32>
    %452 = arith.mulf %450, %451 : vector<2x4xf32>
    %453 = arith.addf %447, %452 : vector<2x4xf32>
    %454 = math.tanh %453 : vector<2x4xf32>
    %455 = vector.extract_strided_slice %429 {offsets = [0, 0], sizes = [2, 1], strides = [1, 1]} : vector<2x4xf32> to vector<2x1xf32>
    %456 = vector.extract_strided_slice %0 {offsets = [0, 0], sizes = [1, 4], strides = [1, 1]} : vector<4x4xf32> to vector<1x4xf32>
    %457 = vector.broadcast %455 : vector<2x1xf32> to vector<2x4xf32>
    %458 = vector.broadcast %456 : vector<1x4xf32> to vector<2x4xf32>
    %459 = arith.mulf %457, %458 : vector<2x4xf32>
    %460 = vector.extract_strided_slice %429 {offsets = [0, 1], sizes = [2, 1], strides = [1, 1]} : vector<2x4xf32> to vector<2x1xf32>
    %461 = vector.extract_strided_slice %0 {offsets = [1, 0], sizes = [1, 4], strides = [1, 1]} : vector<4x4xf32> to vector<1x4xf32>
    %462 = vector.broadcast %460 : vector<2x1xf32> to vector<2x4xf32>
    %463 = vector.broadcast %461 : vector<1x4xf32> to vector<2x4xf32>
    %464 = arith.mulf %462, %463 : vector<2x4xf32>
    %465 = arith.addf %459, %464 : vector<2x4xf32>
    %466 = vector.extract_strided_slice %429 {offsets = [0, 2], sizes = [2, 1], strides = [1, 1]} : vector<2x4xf32> to vector<2x1xf32>
    %467 = vector.extract_strided_slice %0 {offsets = [2, 0], sizes = [1, 4], strides = [1, 1]} : vector<4x4xf32> to vector<1x4xf32>
    %468 = vector.broadcast %466 : vector<2x1xf32> to vector<2x4xf32>
    %469 = vector.broadcast %467 : vector<1x4xf32> to vector<2x4xf32>
    %470 = arith.mulf %468, %469 : vector<2x4xf32>
    %471 = arith.addf %465, %470 : vector<2x4xf32>
    %472 = vector.extract_strided_slice %429 {offsets = [0, 3], sizes = [2, 1], strides = [1, 1]} : vector<2x4xf32> to vector<2x1xf32>
    %473 = vector.extract_strided_slice %0 {offsets = [3, 0], sizes = [1, 4], strides = [1, 1]} : vector<4x4xf32> to vector<1x4xf32>
    %474 = vector.broadcast %472 : vector<2x1xf32> to vector<2x4xf32>
    %475 = vector.broadcast %473 : vector<1x4xf32> to vector<2x4xf32>
    %476 = arith.mulf %474, %475 : vector<2x4xf32>
    %477 = arith.addf %471, %476 : vector<2x4xf32>
    %478 = vector.extract_strided_slice %454 {offsets = [0, 0], sizes = [2, 1], strides = [1, 1]} : vector<2x4xf32> to vector<2x1xf32>
    %479 = vector.extract_strided_slice %2 {offsets = [0, 0], sizes = [1, 4], strides = [1, 1]} : vector<4x4xf32> to vector<1x4xf32>
    %480 = vector.broadcast %478 : vector<2x1xf32> to vector<2x4xf32>
    %481 = vector.broadcast %479 : vector<1x4xf32> to vector<2x4xf32>
    %482 = arith.mulf %480, %481 : vector<2x4xf32>
    %483 = vector.broadcast %3 : vector<1x4xf32> to vector<2x4xf32>
    %484 = arith.addf %483, %482 : vector<2x4xf32>
    %485 = vector.extract_strided_slice %454 {offsets = [0, 1], sizes = [2, 1], strides = [1, 1]} : vector<2x4xf32> to vector<2x1xf32>
    %486 = vector.extract_strided_slice %2 {offsets = [1, 0], sizes = [1, 4], strides = [1, 1]} : vector<4x4xf32> to vector<1x4xf32>
    %487 = vector.broadcast %485 : vector<2x1xf32> to vector<2x4xf32>
    %488 = vector.broadcast %486 : vector<1x4xf32> to vector<2x4xf32>
    %489 = arith.mulf %487, %488 : vector<2x4xf32>
    %490 = arith.addf %484, %489 : vector<2x4xf32>
    %491 = vector.extract_strided_slice %454 {offsets = [0, 2], sizes = [2, 1], strides = [1, 1]} : vector<2x4xf32> to vector<2x1xf32>
    %492 = vector.extract_strided_slice %2 {offsets = [2, 0], sizes = [1, 4], strides = [1, 1]} : vector<4x4xf32> to vector<1x4xf32>
    %493 = vector.broadcast %491 : vector<2x1xf32> to vector<2x4xf32>
    %494 = vector.broadcast %492 : vector<1x4xf32> to vector<2x4xf32>
    %495 = arith.mulf %493, %494 : vector<2x4xf32>
    %496 = arith.addf %490, %495 : vector<2x4xf32>
    %497 = vector.extract_strided_slice %454 {offsets = [0, 3], sizes = [2, 1], strides = [1, 1]} : vector<2x4xf32> to vector<2x1xf32>
    %498 = vector.extract_strided_slice %2 {offsets = [3, 0], sizes = [1, 4], strides = [1, 1]} : vector<4x4xf32> to vector<1x4xf32>
    %499 = vector.broadcast %497 : vector<2x1xf32> to vector<2x4xf32>
    %500 = vector.broadcast %498 : vector<1x4xf32> to vector<2x4xf32>
    %501 = arith.mulf %499, %500 : vector<2x4xf32>
    %502 = arith.addf %496, %501 : vector<2x4xf32>
    %503 = arith.addf %59, %477 : vector<2x4xf32>
    %504 = math.tanh %503 : vector<2x4xf32>
    %505 = vector.extract_strided_slice %504 {offsets = [0, 0], sizes = [2, 1], strides = [1, 1]} : vector<2x4xf32> to vector<2x1xf32>
    %506 = vector.extract_strided_slice %1 {offsets = [0, 0], sizes = [1, 4], strides = [1, 1]} : vector<4x4xf32> to vector<1x4xf32>
    %507 = vector.broadcast %505 : vector<2x1xf32> to vector<2x4xf32>
    %508 = vector.broadcast %506 : vector<1x4xf32> to vector<2x4xf32>
    %509 = arith.mulf %507, %508 : vector<2x4xf32>
    %510 = arith.addf %502, %509 : vector<2x4xf32>
    %511 = vector.extract_strided_slice %504 {offsets = [0, 1], sizes = [2, 1], strides = [1, 1]} : vector<2x4xf32> to vector<2x1xf32>
    %512 = vector.extract_strided_slice %1 {offsets = [1, 0], sizes = [1, 4], strides = [1, 1]} : vector<4x4xf32> to vector<1x4xf32>
    %513 = vector.broadcast %511 : vector<2x1xf32> to vector<2x4xf32>
    %514 = vector.broadcast %512 : vector<1x4xf32> to vector<2x4xf32>
    %515 = arith.mulf %513, %514 : vector<2x4xf32>
    %516 = arith.addf %510, %515 : vector<2x4xf32>
    %517 = vector.extract_strided_slice %504 {offsets = [0, 2], sizes = [2, 1], strides = [1, 1]} : vector<2x4xf32> to vector<2x1xf32>
    %518 = vector.extract_strided_slice %1 {offsets = [2, 0], sizes = [1, 4], strides = [1, 1]} : vector<4x4xf32> to vector<1x4xf32>
    %519 = vector.broadcast %517 : vector<2x1xf32> to vector<2x4xf32>
    %520 = vector.broadcast %518 : vector<1x4xf32> to vector<2x4xf32>
    %521 = arith.mulf %519, %520 : vector<2x4xf32>
    %522 = arith.addf %516, %521 : vector<2x4xf32>
    %523 = vector.extract_strided_slice %504 {offsets = [0, 3], sizes = [2, 1], strides = [1, 1]} : vector<2x4xf32> to vector<2x1xf32>
    %524 = vector.extract_strided_slice %1 {offsets = [3, 0], sizes = [1, 4], strides = [1, 1]} : vector<4x4xf32> to vector<1x4xf32>
    %525 = vector.broadcast %523 : vector<2x1xf32> to vector<2x4xf32>
    %526 = vector.broadcast %524 : vector<1x4xf32> to vector<2x4xf32>
    %527 = arith.mulf %525, %526 : vector<2x4xf32>
    %528 = arith.addf %522, %527 : vector<2x4xf32>
    %529 = math.tanh %528 : vector<2x4xf32>
    %530 = vector.extract_strided_slice %504 {offsets = [0, 0], sizes = [2, 1], strides = [1, 1]} : vector<2x4xf32> to vector<2x1xf32>
    %531 = vector.extract_strided_slice %0 {offsets = [0, 0], sizes = [1, 4], strides = [1, 1]} : vector<4x4xf32> to vector<1x4xf32>
    %532 = vector.broadcast %530 : vector<2x1xf32> to vector<2x4xf32>
    %533 = vector.broadcast %531 : vector<1x4xf32> to vector<2x4xf32>
    %534 = arith.mulf %532, %533 : vector<2x4xf32>
    %535 = vector.extract_strided_slice %504 {offsets = [0, 1], sizes = [2, 1], strides = [1, 1]} : vector<2x4xf32> to vector<2x1xf32>
    %536 = vector.extract_strided_slice %0 {offsets = [1, 0], sizes = [1, 4], strides = [1, 1]} : vector<4x4xf32> to vector<1x4xf32>
    %537 = vector.broadcast %535 : vector<2x1xf32> to vector<2x4xf32>
    %538 = vector.broadcast %536 : vector<1x4xf32> to vector<2x4xf32>
    %539 = arith.mulf %537, %538 : vector<2x4xf32>
    %540 = arith.addf %534, %539 : vector<2x4xf32>
    %541 = vector.extract_strided_slice %504 {offsets = [0, 2], sizes = [2, 1], strides = [1, 1]} : vector<2x4xf32> to vector<2x1xf32>
    %542 = vector.extract_strided_slice %0 {offsets = [2, 0], sizes = [1, 4], strides = [1, 1]} : vector<4x4xf32> to vector<1x4xf32>
    %543 = vector.broadcast %541 : vector<2x1xf32> to vector<2x4xf32>
    %544 = vector.broadcast %542 : vector<1x4xf32> to vector<2x4xf32>
    %545 = arith.mulf %543, %544 : vector<2x4xf32>
    %546 = arith.addf %540, %545 : vector<2x4xf32>
    %547 = vector.extract_strided_slice %504 {offsets = [0, 3], sizes = [2, 1], strides = [1, 1]} : vector<2x4xf32> to vector<2x1xf32>
    %548 = vector.extract_strided_slice %0 {offsets = [3, 0], sizes = [1, 4], strides = [1, 1]} : vector<4x4xf32> to vector<1x4xf32>
    %549 = vector.broadcast %547 : vector<2x1xf32> to vector<2x4xf32>
    %550 = vector.broadcast %548 : vector<1x4xf32> to vector<2x4xf32>
    %551 = arith.mulf %549, %550 : vector<2x4xf32>
    %552 = arith.addf %546, %551 : vector<2x4xf32>
    %553 = vector.extract_strided_slice %529 {offsets = [0, 0], sizes = [2, 1], strides = [1, 1]} : vector<2x4xf32> to vector<2x1xf32>
    %554 = vector.extract_strided_slice %2 {offsets = [0, 0], sizes = [1, 4], strides = [1, 1]} : vector<4x4xf32> to vector<1x4xf32>
    %555 = vector.broadcast %553 : vector<2x1xf32> to vector<2x4xf32>
    %556 = vector.broadcast %554 : vector<1x4xf32> to vector<2x4xf32>
    %557 = arith.mulf %555, %556 : vector<2x4xf32>
    %558 = vector.broadcast %3 : vector<1x4xf32> to vector<2x4xf32>
    %559 = arith.addf %558, %557 : vector<2x4xf32>
    %560 = vector.extract_strided_slice %529 {offsets = [0, 1], sizes = [2, 1], strides = [1, 1]} : vector<2x4xf32> to vector<2x1xf32>
    %561 = vector.extract_strided_slice %2 {offsets = [1, 0], sizes = [1, 4], strides = [1, 1]} : vector<4x4xf32> to vector<1x4xf32>
    %562 = vector.broadcast %560 : vector<2x1xf32> to vector<2x4xf32>
    %563 = vector.broadcast %561 : vector<1x4xf32> to vector<2x4xf32>
    %564 = arith.mulf %562, %563 : vector<2x4xf32>
    %565 = arith.addf %559, %564 : vector<2x4xf32>
    %566 = vector.extract_strided_slice %529 {offsets = [0, 2], sizes = [2, 1], strides = [1, 1]} : vector<2x4xf32> to vector<2x1xf32>
    %567 = vector.extract_strided_slice %2 {offsets = [2, 0], sizes = [1, 4], strides = [1, 1]} : vector<4x4xf32> to vector<1x4xf32>
    %568 = vector.broadcast %566 : vector<2x1xf32> to vector<2x4xf32>
    %569 = vector.broadcast %567 : vector<1x4xf32> to vector<2x4xf32>
    %570 = arith.mulf %568, %569 : vector<2x4xf32>
    %571 = arith.addf %565, %570 : vector<2x4xf32>
    %572 = vector.extract_strided_slice %529 {offsets = [0, 3], sizes = [2, 1], strides = [1, 1]} : vector<2x4xf32> to vector<2x1xf32>
    %573 = vector.extract_strided_slice %2 {offsets = [3, 0], sizes = [1, 4], strides = [1, 1]} : vector<4x4xf32> to vector<1x4xf32>
    %574 = vector.broadcast %572 : vector<2x1xf32> to vector<2x4xf32>
    %575 = vector.broadcast %573 : vector<1x4xf32> to vector<2x4xf32>
    %576 = arith.mulf %574, %575 : vector<2x4xf32>
    %577 = arith.addf %571, %576 : vector<2x4xf32>
    %578 = arith.addf %68, %552 : vector<2x4xf32>
    %579 = math.tanh %578 : vector<2x4xf32>
    %580 = vector.extract_strided_slice %579 {offsets = [0, 0], sizes = [2, 1], strides = [1, 1]} : vector<2x4xf32> to vector<2x1xf32>
    %581 = vector.extract_strided_slice %1 {offsets = [0, 0], sizes = [1, 4], strides = [1, 1]} : vector<4x4xf32> to vector<1x4xf32>
    %582 = vector.broadcast %580 : vector<2x1xf32> to vector<2x4xf32>
    %583 = vector.broadcast %581 : vector<1x4xf32> to vector<2x4xf32>
    %584 = arith.mulf %582, %583 : vector<2x4xf32>
    %585 = arith.addf %577, %584 : vector<2x4xf32>
    %586 = vector.extract_strided_slice %579 {offsets = [0, 1], sizes = [2, 1], strides = [1, 1]} : vector<2x4xf32> to vector<2x1xf32>
    %587 = vector.extract_strided_slice %1 {offsets = [1, 0], sizes = [1, 4], strides = [1, 1]} : vector<4x4xf32> to vector<1x4xf32>
    %588 = vector.broadcast %586 : vector<2x1xf32> to vector<2x4xf32>
    %589 = vector.broadcast %587 : vector<1x4xf32> to vector<2x4xf32>
    %590 = arith.mulf %588, %589 : vector<2x4xf32>
    %591 = arith.addf %585, %590 : vector<2x4xf32>
    %592 = vector.extract_strided_slice %579 {offsets = [0, 2], sizes = [2, 1], strides = [1, 1]} : vector<2x4xf32> to vector<2x1xf32>
    %593 = vector.extract_strided_slice %1 {offsets = [2, 0], sizes = [1, 4], strides = [1, 1]} : vector<4x4xf32> to vector<1x4xf32>
    %594 = vector.broadcast %592 : vector<2x1xf32> to vector<2x4xf32>
    %595 = vector.broadcast %593 : vector<1x4xf32> to vector<2x4xf32>
    %596 = arith.mulf %594, %595 : vector<2x4xf32>
    %597 = arith.addf %591, %596 : vector<2x4xf32>
    %598 = vector.extract_strided_slice %579 {offsets = [0, 3], sizes = [2, 1], strides = [1, 1]} : vector<2x4xf32> to vector<2x1xf32>
    %599 = vector.extract_strided_slice %1 {offsets = [3, 0], sizes = [1, 4], strides = [1, 1]} : vector<4x4xf32> to vector<1x4xf32>
    %600 = vector.broadcast %598 : vector<2x1xf32> to vector<2x4xf32>
    %601 = vector.broadcast %599 : vector<1x4xf32> to vector<2x4xf32>
    %602 = arith.mulf %600, %601 : vector<2x4xf32>
    %603 = arith.addf %597, %602 : vector<2x4xf32>
    %604 = math.tanh %603 : vector<2x4xf32>
    %605 = vector.extract_strided_slice %579 {offsets = [0, 0], sizes = [2, 1], strides = [1, 1]} : vector<2x4xf32> to vector<2x1xf32>
    %606 = vector.extract_strided_slice %0 {offsets = [0, 0], sizes = [1, 4], strides = [1, 1]} : vector<4x4xf32> to vector<1x4xf32>
    %607 = vector.broadcast %605 : vector<2x1xf32> to vector<2x4xf32>
    %608 = vector.broadcast %606 : vector<1x4xf32> to vector<2x4xf32>
    %609 = arith.mulf %607, %608 : vector<2x4xf32>
    %610 = vector.extract_strided_slice %579 {offsets = [0, 1], sizes = [2, 1], strides = [1, 1]} : vector<2x4xf32> to vector<2x1xf32>
    %611 = vector.extract_strided_slice %0 {offsets = [1, 0], sizes = [1, 4], strides = [1, 1]} : vector<4x4xf32> to vector<1x4xf32>
    %612 = vector.broadcast %610 : vector<2x1xf32> to vector<2x4xf32>
    %613 = vector.broadcast %611 : vector<1x4xf32> to vector<2x4xf32>
    %614 = arith.mulf %612, %613 : vector<2x4xf32>
    %615 = arith.addf %609, %614 : vector<2x4xf32>
    %616 = vector.extract_strided_slice %579 {offsets = [0, 2], sizes = [2, 1], strides = [1, 1]} : vector<2x4xf32> to vector<2x1xf32>
    %617 = vector.extract_strided_slice %0 {offsets = [2, 0], sizes = [1, 4], strides = [1, 1]} : vector<4x4xf32> to vector<1x4xf32>
    %618 = vector.broadcast %616 : vector<2x1xf32> to vector<2x4xf32>
    %619 = vector.broadcast %617 : vector<1x4xf32> to vector<2x4xf32>
    %620 = arith.mulf %618, %619 : vector<2x4xf32>
    %621 = arith.addf %615, %620 : vector<2x4xf32>
    %622 = vector.extract_strided_slice %579 {offsets = [0, 3], sizes = [2, 1], strides = [1, 1]} : vector<2x4xf32> to vector<2x1xf32>
    %623 = vector.extract_strided_slice %0 {offsets = [3, 0], sizes = [1, 4], strides = [1, 1]} : vector<4x4xf32> to vector<1x4xf32>
    %624 = vector.broadcast %622 : vector<2x1xf32> to vector<2x4xf32>
    %625 = vector.broadcast %623 : vector<1x4xf32> to vector<2x4xf32>
    %626 = arith.mulf %624, %625 : vector<2x4xf32>
    %627 = arith.addf %621, %626 : vector<2x4xf32>
    %628 = vector.extract_strided_slice %604 {offsets = [0, 0], sizes = [2, 1], strides = [1, 1]} : vector<2x4xf32> to vector<2x1xf32>
    %629 = vector.extract_strided_slice %2 {offsets = [0, 0], sizes = [1, 4], strides = [1, 1]} : vector<4x4xf32> to vector<1x4xf32>
    %630 = vector.broadcast %628 : vector<2x1xf32> to vector<2x4xf32>
    %631 = vector.broadcast %629 : vector<1x4xf32> to vector<2x4xf32>
    %632 = arith.mulf %630, %631 : vector<2x4xf32>
    %633 = vector.broadcast %3 : vector<1x4xf32> to vector<2x4xf32>
    %634 = arith.addf %633, %632 : vector<2x4xf32>
    %635 = vector.extract_strided_slice %604 {offsets = [0, 1], sizes = [2, 1], strides = [1, 1]} : vector<2x4xf32> to vector<2x1xf32>
    %636 = vector.extract_strided_slice %2 {offsets = [1, 0], sizes = [1, 4], strides = [1, 1]} : vector<4x4xf32> to vector<1x4xf32>
    %637 = vector.broadcast %635 : vector<2x1xf32> to vector<2x4xf32>
    %638 = vector.broadcast %636 : vector<1x4xf32> to vector<2x4xf32>
    %639 = arith.mulf %637, %638 : vector<2x4xf32>
    %640 = arith.addf %634, %639 : vector<2x4xf32>
    %641 = vector.extract_strided_slice %604 {offsets = [0, 2], sizes = [2, 1], strides = [1, 1]} : vector<2x4xf32> to vector<2x1xf32>
    %642 = vector.extract_strided_slice %2 {offsets = [2, 0], sizes = [1, 4], strides = [1, 1]} : vector<4x4xf32> to vector<1x4xf32>
    %643 = vector.broadcast %641 : vector<2x1xf32> to vector<2x4xf32>
    %644 = vector.broadcast %642 : vector<1x4xf32> to vector<2x4xf32>
    %645 = arith.mulf %643, %644 : vector<2x4xf32>
    %646 = arith.addf %640, %645 : vector<2x4xf32>
    %647 = vector.extract_strided_slice %604 {offsets = [0, 3], sizes = [2, 1], strides = [1, 1]} : vector<2x4xf32> to vector<2x1xf32>
    %648 = vector.extract_strided_slice %2 {offsets = [3, 0], sizes = [1, 4], strides = [1, 1]} : vector<4x4xf32> to vector<1x4xf32>
    %649 = vector.broadcast %647 : vector<2x1xf32> to vector<2x4xf32>
    %650 = vector.broadcast %648 : vector<1x4xf32> to vector<2x4xf32>
    %651 = arith.mulf %649, %650 : vector<2x4xf32>
    %652 = arith.addf %646, %651 : vector<2x4xf32>
    %653 = arith.addf %77, %627 : vector<2x4xf32>
    %654 = math.tanh %653 : vector<2x4xf32>
    %655 = vector.extract_strided_slice %654 {offsets = [0, 0], sizes = [2, 1], strides = [1, 1]} : vector<2x4xf32> to vector<2x1xf32>
    %656 = vector.extract_strided_slice %1 {offsets = [0, 0], sizes = [1, 4], strides = [1, 1]} : vector<4x4xf32> to vector<1x4xf32>
    %657 = vector.broadcast %655 : vector<2x1xf32> to vector<2x4xf32>
    %658 = vector.broadcast %656 : vector<1x4xf32> to vector<2x4xf32>
    %659 = arith.mulf %657, %658 : vector<2x4xf32>
    %660 = arith.addf %652, %659 : vector<2x4xf32>
    %661 = vector.extract_strided_slice %654 {offsets = [0, 1], sizes = [2, 1], strides = [1, 1]} : vector<2x4xf32> to vector<2x1xf32>
    %662 = vector.extract_strided_slice %1 {offsets = [1, 0], sizes = [1, 4], strides = [1, 1]} : vector<4x4xf32> to vector<1x4xf32>
    %663 = vector.broadcast %661 : vector<2x1xf32> to vector<2x4xf32>
    %664 = vector.broadcast %662 : vector<1x4xf32> to vector<2x4xf32>
    %665 = arith.mulf %663, %664 : vector<2x4xf32>
    %666 = arith.addf %660, %665 : vector<2x4xf32>
    %667 = vector.extract_strided_slice %654 {offsets = [0, 2], sizes = [2, 1], strides = [1, 1]} : vector<2x4xf32> to vector<2x1xf32>
    %668 = vector.extract_strided_slice %1 {offsets = [2, 0], sizes = [1, 4], strides = [1, 1]} : vector<4x4xf32> to vector<1x4xf32>
    %669 = vector.broadcast %667 : vector<2x1xf32> to vector<2x4xf32>
    %670 = vector.broadcast %668 : vector<1x4xf32> to vector<2x4xf32>
    %671 = arith.mulf %669, %670 : vector<2x4xf32>
    %672 = arith.addf %666, %671 : vector<2x4xf32>
    %673 = vector.extract_strided_slice %654 {offsets = [0, 3], sizes = [2, 1], strides = [1, 1]} : vector<2x4xf32> to vector<2x1xf32>
    %674 = vector.extract_strided_slice %1 {offsets = [3, 0], sizes = [1, 4], strides = [1, 1]} : vector<4x4xf32> to vector<1x4xf32>
    %675 = vector.broadcast %673 : vector<2x1xf32> to vector<2x4xf32>
    %676 = vector.broadcast %674 : vector<1x4xf32> to vector<2x4xf32>
    %677 = arith.mulf %675, %676 : vector<2x4xf32>
    %678 = arith.addf %672, %677 : vector<2x4xf32>
    %679 = math.tanh %678 : vector<2x4xf32>
    %680 = vector.extract_strided_slice %154 {offsets = [0, 0], sizes = [1, 4], strides = [1, 1]} : vector<2x4xf32> to vector<1x4xf32>
    %681 = vector.extract_strided_slice %229 {offsets = [0, 0], sizes = [1, 4], strides = [1, 1]} : vector<2x4xf32> to vector<1x4xf32>
    %682 = vector.extract_strided_slice %304 {offsets = [0, 0], sizes = [1, 4], strides = [1, 1]} : vector<2x4xf32> to vector<1x4xf32>
    %683 = vector.extract_strided_slice %379 {offsets = [0, 0], sizes = [1, 4], strides = [1, 1]} : vector<2x4xf32> to vector<1x4xf32>
    %684 = vector.extract_strided_slice %454 {offsets = [0, 0], sizes = [1, 4], strides = [1, 1]} : vector<2x4xf32> to vector<1x4xf32>
    %685 = vector.extract_strided_slice %529 {offsets = [0, 0], sizes = [1, 4], strides = [1, 1]} : vector<2x4xf32> to vector<1x4xf32>
    %686 = vector.extract_strided_slice %604 {offsets = [0, 0], sizes = [1, 4], strides = [1, 1]} : vector<2x4xf32> to vector<1x4xf32>
    %687 = vector.extract_strided_slice %679 {offsets = [0, 0], sizes = [1, 4], strides = [1, 1]} : vector<2x4xf32> to vector<1x4xf32>
    %688 = vector.extract_strided_slice %154 {offsets = [1, 0], sizes = [1, 4], strides = [1, 1]} : vector<2x4xf32> to vector<1x4xf32>
    %689 = vector.extract_strided_slice %229 {offsets = [1, 0], sizes = [1, 4], strides = [1, 1]} : vector<2x4xf32> to vector<1x4xf32>
    %690 = vector.extract_strided_slice %304 {offsets = [1, 0], sizes = [1, 4], strides = [1, 1]} : vector<2x4xf32> to vector<1x4xf32>
    %691 = vector.extract_strided_slice %379 {offsets = [1, 0], sizes = [1, 4], strides = [1, 1]} : vector<2x4xf32> to vector<1x4xf32>
    %692 = vector.extract_strided_slice %454 {offsets = [1, 0], sizes = [1, 4], strides = [1, 1]} : vector<2x4xf32> to vector<1x4xf32>
    %693 = vector.extract_strided_slice %529 {offsets = [1, 0], sizes = [1, 4], strides = [1, 1]} : vector<2x4xf32> to vector<1x4xf32>
    %694 = vector.extract_strided_slice %604 {offsets = [1, 0], sizes = [1, 4], strides = [1, 1]} : vector<2x4xf32> to vector<1x4xf32>
    %695 = vector.extract_strided_slice %679 {offsets = [1, 0], sizes = [1, 4], strides = [1, 1]} : vector<2x4xf32> to vector<1x4xf32>
    %696 = tpu.concatenate %680, %681, %682, %683, %684, %685, %686, %687, %688, %689, %690, %691, %692, %693, %694, %695 in 0 : vector<1x4xf32>, vector<1x4xf32>, vector<1x4xf32>, vector<1x4xf32>, vector<1x4xf32>, vector<1x4xf32>, vector<1x4xf32>, vector<1x4xf32>, vector<1x4xf32>, vector<1x4xf32>, vector<1x4xf32>, vector<1x4xf32>, vector<1x4xf32>, vector<1x4xf32>, vector<1x4xf32>, vector<1x4xf32> -> vector<16x4xf32>
    %697 = vector.extract_strided_slice %696 {offsets = [0, 0], sizes = [16, 1], strides = [1, 1]} : vector<16x4xf32> to vector<16x1xf32>
    %698 = vector.extract_strided_slice %4 {offsets = [0, 0], sizes = [1, 4], strides = [1, 1]} : vector<4x4xf32> to vector<1x4xf32>
    %699 = vector.broadcast %697 : vector<16x1xf32> to vector<16x4xf32>
    %700 = vector.broadcast %698 : vector<1x4xf32> to vector<16x4xf32>
    %701 = arith.mulf %699, %700 : vector<16x4xf32>
    %702 = vector.broadcast %5 : vector<1x4xf32> to vector<16x4xf32>
    %703 = arith.addf %702, %701 : vector<16x4xf32>
    %704 = vector.extract_strided_slice %696 {offsets = [0, 1], sizes = [16, 1], strides = [1, 1]} : vector<16x4xf32> to vector<16x1xf32>
    %705 = vector.extract_strided_slice %4 {offsets = [1, 0], sizes = [1, 4], strides = [1, 1]} : vector<4x4xf32> to vector<1x4xf32>
    %706 = vector.broadcast %704 : vector<16x1xf32> to vector<16x4xf32>
    %707 = vector.broadcast %705 : vector<1x4xf32> to vector<16x4xf32>
    %708 = arith.mulf %706, %707 : vector<16x4xf32>
    %709 = arith.addf %703, %708 : vector<16x4xf32>
    %710 = vector.extract_strided_slice %696 {offsets = [0, 2], sizes = [16, 1], strides = [1, 1]} : vector<16x4xf32> to vector<16x1xf32>
    %711 = vector.extract_strided_slice %4 {offsets = [2, 0], sizes = [1, 4], strides = [1, 1]} : vector<4x4xf32> to vector<1x4xf32>
    %712 = vector.broadcast %710 : vector<16x1xf32> to vector<16x4xf32>
    %713 = vector.broadcast %711 : vector<1x4xf32> to vector<16x4xf32>
    %714 = arith.mulf %712, %713 : vector<16x4xf32>
    %715 = arith.addf %709, %714 : vector<16x4xf32>
    %716 = vector.extract_strided_slice %696 {offsets = [0, 3], sizes = [16, 1], strides = [1, 1]} : vector<16x4xf32> to vector<16x1xf32>
    %717 = vector.extract_strided_slice %4 {offsets = [3, 0], sizes = [1, 4], strides = [1, 1]} : vector<4x4xf32> to vector<1x4xf32>
    %718 = vector.broadcast %716 : vector<16x1xf32> to vector<16x4xf32>
    %719 = vector.broadcast %717 : vector<1x4xf32> to vector<16x4xf32>
    %720 = arith.mulf %718, %719 : vector<16x4xf32>
    %721 = arith.addf %715, %720 : vector<16x4xf32>
    %c0_41 = arith.constant 0 : index
    %c0_42 = arith.constant 0 : index
    %722 = vector.load %arg2[%c0_41, %c0_42] : memref<16x4xf32, #tpu.memory_space<vmem>>, vector<16x4xf32>
    tpu.vector_store %arg2[%c0_41, %c0_42], %721 {strides = array<i32>} : memref<16x4xf32, #tpu.memory_space<vmem>>, vector<16x4xf32>,
    return
  }
}

</mosaic_0001>

<bundles_post_ra>
// kernel: model_forward.1
= control target key start
LH: loop header
LB: loop body
LE: loop exit
PB: predicated region body
PF: predicated region fallthrough
CT: control target
= control target key end

     0   :  { %7 = vsyncpa [#allocation3], 0  ;;  %s852_s12 = smov [#allocation2]   ;;  %s1196_s0 = inlined_call_operand.vmem [shape: s32[16], index: 0, kind: input, shape index: {}]   ;;  %s1197_s1 = inlined_call_operand.vmem [shape: f32[22,4], index: 1, kind: input, shape index: {}]   ;;  %s1198_s2 = inlined_call_operand.vmem [shape: f32[16,4], index: 2, kind: output, shape index: {}]  }
   0x1   :  { %s13_s11 = sshll.u32 %s1196_s0, 4  ;;  %s14_s11 = int_to_ptr.vmem [resolvable:$true] %s13_s11 }
   0x2   :  { %16 = dma.vmem_to_smem %s14_s11, 16, %s852_s12, [#allocation3]  }
   0x3   :  { %850 = dma.done.wait [#allocation3], 16  }
   0x4   :  { %851 = vsyncadd [#allocation3], 4294967280 }
   0x5   :  { %23 = sfence }
   0x6   :  { %v24_v0 = vld [vmem:[%s1197_s1 + $0x4] sm:$0xf]  ;;  %s30_s15 = sld [smem:[#allocation2]]  ;;  %v853_v1 = vmov 0   ;;  %v854_v9 = vmov 2   ;;  %vm39_vm0 = vcmask 1040384  }
   0x7   :  { %735 = vset.pattern.permute.xlu0 %v853_v1  ;;  %s715_s16 = sld [smem:[#allocation2 + $0x8]]  ;;  %v879_v2 = vperm.slane %v24_v0, 0  ;;  %v881_v3 = vperm.slane %v24_v0, 1  ;;  %v883_v4 = vperm.slane %v24_v0, 2  ;;  %v885_v5 = vperm.slane %v24_v0, 3  ;;  %739 = vset.pattern.permute.xlu2 %v853_v1 }
   0x8   :  { %737 = vset.pattern.permute.xlu1 %v854_v9  ;;  %v855_v20 = vmov 1   ;;  %v856_v21 = vmov 3   ;;  %v26_v22 = vld [vmem:[%s1197_s1 + $0xc] sm:$0xf]  ;;  %v913_v25 = vld [vmem:[%s1197_s1 + $0x10] ss:$0 sm:$0xff] }
   0x9   :  { %v112_v6 = vmul.f32 0.0, %v879_v2  ;;  %v114_v7 = vmul.f32 0.0, %v881_v3  ;;  %v117_v8 = vmul.f32 0.0, %v883_v4  ;;  %v120_v11 = vmul.f32 0.0, %v885_v5  ;;  %s717_s26 = sld [smem:[#allocation2 + $0x9]] }
   0xa   :  { %v907_v23 = vperm.slane %v26_v22, 0  ;;  %v915_v26 = vperm.slane %v26_v22, 1  ;;  %v919_v29 = vperm.slane %v26_v22, 2  ;;  %v922_v32 = vperm.slane %v26_v22, 3  ;;  %v25_v33 = vld [vmem:[%s1197_s1 + $0x8] sm:$0xf] }
   0xb   :  { %v115_v10 = vadd.f32 %v114_v7, %v112_v6  ;;  %s716_s29 = sld [smem:[#allocation2 + $0x1]]  ;;  %v928_v38 = vperm.slane %v25_v33, 0  ;;  %v934_v41 = vperm.slane %v25_v33, 1  ;;  %v936_v42 = vperm.slane %v25_v33, 2 }
   0xc   :  { %s31_s18 = scalar_lea.vmem %s1197_s1, %s30_s15  ;;  %v123_v24 = vmul.f32 0.0, %v907_v23  ;;  %v127_v28 = vmul.f32 0.0, %v915_v26  ;;  %v130_v31 = vmul.f32 0.0, %v919_v29  ;;  %v133_v37 = vmul.f32 0.0, %v922_v32  ;;  %s719_s8 = sld [smem:[#allocation2 + $0xa]] }
   0xd   :  { %s34_s21 = scalar_lea.vmem %s1197_s1, %s715_s16  ;;  %v118_v12 = vadd.f32 %v117_v8, %v115_v10  ;;  %v32_v13 = vld [vmem:[%s31_s18] sm:$0x1]  ;;  %v938_v44 = vperm.slane %v25_v33, 3  ;;  %s718_s9 = sld [smem:[#allocation2 + $0x2]]  ;;  %vm617_vm1 = vcmask 1041408   ;;  %vm619_vm2 = vcmask 1042432  }
   0xe   :  { %v35_v14 = vld [vmem:[%s34_s21] sm:$0x1]  ;;  %v125_v27 = vadd.f32 %v913_v25, %v123_v24  ;;  %s721_s16 = sld [smem:[#allocation2 + $0xb]]  ;;  %vm621_vm3 = vcmask 1043456   ;;  %vm623_vm4 = vcmask 1044480   ;;  %vm625_vm5 = vcmask 1045504  }
   0xf   :  { %v37_v15 = vrot.slane %v35_v14, 7  ;;  %v121_v16 = vadd.f32 %v120_v11, %v118_v12  ;;  %s45_s4 = scalar_lea.vmem %s1197_s1, %s717_s26  ;;  %s720_s0 = sld [smem:[#allocation2 + $0x3]]  ;;  %vm627_vm6 = vcmask 1046528   ;;  %vm691_vm7 = vcmask 31744  }
  0x10   :  { %v128_v30 = vadd.f32 %v127_v28, %v125_v27  ;;  %v46_v43 = vld [vmem:[%s45_s4] sm:$0x1]  ;;  %s723_s23 = sld [smem:[#allocation2 + $0xc]] }
  0x11   :  { %v40_v17 = vsel %vm39_vm0, %v32_v13, %v37_v15  ;;  %s42_s7 = scalar_lea.vmem %s1197_s1, %s716_s29  ;;  %v48_v53 = vrot.slane %v46_v43, 7  ;;  %s722_s24 = sld [smem:[#allocation2 + $0x4]] }
  0x12   :  { %v135_v18 = vadd.f32 %v121_v16, %v40_v17  ;;  %v131_v36 = vadd.f32 %v130_v31, %v128_v30  ;;  %v43_v56 = vld [vmem:[%s42_s7] sm:$0x1]  ;;  %s55_s12 = scalar_lea.vmem %s1197_s1, %s719_s8  ;;  %s725_s3 = sld [smem:[#allocation2 + $0xd]] }
  0x13   :  { %v50_v61 = vsel %vm39_vm0, %v43_v56, %v48_v53  ;;  %s52_s15 = scalar_lea.vmem %s1197_s1, %s718_s9  ;;  %s724_s4 = sld [smem:[#allocation2 + $0x5]] }
  0x14   :  { %806 = vtanh.f32 %v135_v18  ;;  %v134_v39 = vadd.f32 %v133_v37, %v131_v36  ;;  %s65_s19 = scalar_lea.vmem %s1197_s1, %s721_s16  ;;  %s727_s11 = sld [smem:[#allocation2 + $0xe]] }
  0x15   :  { %s62_s22 = scalar_lea.vmem %s1197_s1, %s720_s0  ;;  %s729_s18 = sld [smem:[#allocation2 + $0xf]] }
  0x16   :  { %s75_s27 = scalar_lea.vmem %s1197_s1, %s723_s23 }
  0x17   :  { %s72_s30 = scalar_lea.vmem %s1197_s1, %s722_s24 }
  0x18   :  { %s85_s7 = scalar_lea.vmem %s1197_s1, %s725_s3 }
  0x19   :  { %s82_s10 = scalar_lea.vmem %s1197_s1, %s724_s4 }
  0x1a   :  { %v807_v19 = vpop.eup %806 }
  0x1b   :  { %139 = vperm.xlu0 %735, %v807_v19   ;;  %153 = vperm.xlu1 %737, %v807_v19  }
  0x23   :  { %736 = vset.pattern.permute.xlu0 %v855_v20  ;;  %738 = vset.pattern.permute.xlu1 %v856_v21 }
  0x24   :  { %146 = vperm.xlu0 %736, %v807_v19   ;;  %160 = vperm.xlu1 %738, %v807_v19  }
  0x2c   :  { %741 = vset.pattern.permute.xlu1 %v854_v9  ;;  %743 = vset.pattern.permute.xlu0 %v853_v1 }
  0x8d   :  { %v140_v34 = vpop.permute.xlu0 %139  ;;  %v154_v35 = vpop.permute.xlu1 %153 }
  0x8e   :  { %v143_v40 = vmul.f32 %v928_v38, %v140_v34  ;;  %v167_v48 = vmul.f32 %v140_v34, %v879_v2  ;;  %v157_v51 = vmul.f32 %v936_v42, %v154_v35  ;;  %v170_v52 = vmul.f32 %v154_v35, %v883_v4 }
  0x90   :  { %v144_v47 = vadd.f32 %v143_v40, %v134_v39  ;;  %v56_v40 = vld [vmem:[%s55_s12] sm:$0x1]  ;;  %s726_s12 = sld [smem:[#allocation2 + $0x6]] }
  0x96   :  { %v147_v45 = vpop.permute.xlu0 %146  ;;  %v161_v46 = vpop.permute.xlu1 %160  ;;  %s92_s17 = scalar_lea.vmem %s1197_s1, %s726_s12 }
  0x97   :  { %v150_v49 = vmul.f32 %v934_v41, %v147_v45  ;;  %v168_v50 = vmul.f32 %v147_v45, %v881_v3  ;;  %v164_v57 = vmul.f32 %v938_v44, %v161_v46  ;;  %v172_v58 = vmul.f32 %v161_v46, %v885_v5 }
  0x99   :  { %v151_v54 = vadd.f32 %v150_v49, %v144_v47  ;;  %v169_v55 = vadd.f32 %v168_v50, %v167_v48  ;;  %v58_v49 = vrot.slane %v56_v40, 7 }
  0x9b   :  { %v158_v59 = vadd.f32 %v157_v51, %v151_v54  ;;  %v171_v60 = vadd.f32 %v170_v52, %v169_v55  ;;  %v53_v51 = vld [vmem:[%s52_s15] sm:$0x1]  ;;  %s95_s15 = scalar_lea.vmem %s1197_s1, %s727_s11 }
  0x9c   :  { %v60_v54 = vsel %vm39_vm0, %v53_v51, %v58_v49 }
  0x9d   :  { %v165_v62 = vadd.f32 %v164_v57, %v158_v59  ;;  %v173_v63 = vadd.f32 %v172_v58, %v171_v60 }
  0x9f   :  { %808 = vtanh.f32 %v165_v62  ;;  %v199_v0 = vadd.f32 %v173_v63, %v50_v61 }
  0xa1   :  { %810 = vtanh.f32 %v199_v0 }
  0xa5   :  { %v951_v6 = vpop.eup %808 }
  0xa6   :  { %188 = vperm.xlu1 %741, %v951_v6   ;;  %176 = vperm.xlu2 %739, %v951_v6  }
  0xa7   :  { %v811_v7 = vpop.eup %810 }
  0xa8   :  { %203 = vperm.xlu0 %743, %v811_v7  }
  0xae   :  { %744 = vset.pattern.permute.xlu1 %v855_v20  ;;  %740 = vset.pattern.permute.xlu2 %v855_v20 }
  0xaf   :  { %182 = vperm.xlu2 %740, %v951_v6   ;;  %209 = vperm.xlu1 %744, %v811_v7  }
  0xb0   :  { %748 = vset.pattern.permute.xlu0 %v855_v20 }
  0xb7   :  { %742 = vset.pattern.permute.xlu2 %v856_v21  ;;  %746 = vset.pattern.permute.xlu1 %v856_v21 }
  0xb8   :  { %194 = vperm.xlu2 %742, %v951_v6   ;;  %221 = vperm.xlu1 %746, %v811_v7  }
  0xc0   :  { %745 = vset.pattern.permute.xlu2 %v854_v9  ;;  %749 = vset.pattern.permute.xlu1 %v854_v9 }
  0xc1   :  { %215 = vperm.xlu2 %745, %v811_v7  }
  0xc9   :  { %747 = vset.pattern.permute.xlu2 %v853_v1 }
 0x100   :  { %v177_v8 = vpop.permute.xlu2 %176 }
 0x101   :  { %v179_v11 = vmul.f32 %v177_v8, %v907_v23 }
 0x103   :  { %v180_v14 = vadd.f32 %v913_v25, %v179_v11 }
 0x109   :  { %v183_v10 = vpop.permute.xlu2 %182 }
 0x10a   :  { %v185_v12 = vmul.f32 %v183_v10, %v915_v26 }
 0x10c   :  { %v186_v16 = vadd.f32 %v185_v12, %v180_v14 }
 0x112   :  { %v195_v17 = vpop.permute.xlu2 %194 }
 0x113   :  { %v197_v19 = vmul.f32 %v195_v17, %v922_v32 }
 0x118   :  { %v189_v13 = vpop.permute.xlu1 %188 }
 0x119   :  { %v191_v15 = vmul.f32 %v189_v13, %v919_v29 }
 0x11a   :  { %v204_v22 = vpop.permute.xlu0 %203 }
 0x11b   :  { %v192_v18 = vadd.f32 %v191_v15, %v186_v16  ;;  %v206_v28 = vmul.f32 %v204_v22, %v928_v38  ;;  %v216_v33 = vpop.permute.xlu2 %215  ;;  %v227_v36 = vmul.f32 %v204_v22, %v879_v2 }
 0x11c   :  { %v218_v37 = vmul.f32 %v216_v33, %v936_v42  ;;  %v230_v47 = vmul.f32 %v216_v33, %v883_v4 }
 0x11d   :  { %v198_v24 = vadd.f32 %v197_v19, %v192_v18 }
 0x11f   :  { %v207_v31 = vadd.f32 %v206_v28, %v198_v24 }
 0x121   :  { %v210_v27 = vpop.permute.xlu1 %209 }
 0x122   :  { %v212_v30 = vmul.f32 %v210_v27, %v934_v41  ;;  %v228_v34 = vmul.f32 %v210_v27, %v881_v3 }
 0x124   :  { %v213_v35 = vadd.f32 %v212_v30, %v207_v31  ;;  %v229_v39 = vadd.f32 %v228_v34, %v227_v36  ;;  %v66_v30 = vld [vmem:[%s65_s19] sm:$0x1]  ;;  %s728_s19 = sld [smem:[#allocation2 + $0x7]] }
 0x126   :  { %v219_v45 = vadd.f32 %v218_v37, %v213_v35  ;;  %v231_v52 = vadd.f32 %v230_v47, %v229_v39  ;;  %v68_v37 = vrot.slane %v66_v30, 7 }
 0x12a   :  { %v222_v43 = vpop.permute.xlu1 %221  ;;  %s102_s25 = scalar_lea.vmem %s1197_s1, %s728_s19 }
 0x12b   :  { %v224_v46 = vmul.f32 %v222_v43, %v938_v44  ;;  %v232_v48 = vmul.f32 %v222_v43, %v885_v5  ;;  %v63_v43 = vld [vmem:[%s62_s22] sm:$0x1]  ;;  %s105_s22 = scalar_lea.vmem %s1197_s1, %s729_s18 }
 0x12d   :  { %v225_v50 = vadd.f32 %v224_v46, %v219_v45  ;;  %v233_v53 = vadd.f32 %v232_v48, %v231_v52  ;;  %v70_v46 = vsel %vm39_vm0, %v63_v43, %v68_v37 }
 0x12f   :  { %812 = vtanh.f32 %v225_v50  ;;  %v259_v55 = vadd.f32 %v233_v53, %v60_v54  ;;  %v602_v50 = vrot.slane %v951_v6, 1 }
 0x131   :  { %814 = vtanh.f32 %v259_v55 }
 0x135   :  { %v985_v56 = vpop.eup %812 }
 0x136   :  { %248 = vperm.xlu1 %749, %v985_v56   ;;  %242 = vperm.xlu0 %748, %v985_v56   ;;  %v587_v47 = vrot.slane %v985_v56, 7  ;;  %v629_v53 = vsel %vm39_vm0, %v602_v50, %v985_v56 }
 0x137   :  { %236 = vperm.xlu2 %747, %v985_v56   ;;  %v815_v57 = vpop.eup %814 }
 0x138   :  { %v616_v54 = vsel %vm39_vm0, %v951_v6, %v587_v47 }
 0x13e   :  { %750 = vset.pattern.permute.xlu1 %v853_v1  ;;  %753 = vset.pattern.permute.xlu0 %v854_v9 }
 0x13f   :  { %751 = vset.pattern.permute.xlu2 %v856_v21  ;;  %263 = vperm.xlu1 %750, %v815_v57  }
 0x140   :  { %275 = vperm.xlu0 %753, %v815_v57   ;;  %254 = vperm.xlu2 %751, %v985_v56  }
 0x147   :  { %754 = vset.pattern.permute.xlu1 %v856_v21 }
 0x148   :  { %752 = vset.pattern.permute.xlu2 %v855_v20  ;;  %281 = vperm.xlu1 %754, %v815_v57  }
 0x149   :  { %269 = vperm.xlu2 %752, %v815_v57   ;;  %758 = vset.pattern.permute.xlu0 %v856_v21 }
 0x150   :  { %756 = vset.pattern.permute.xlu1 %v855_v20 }
 0x151   :  { %755 = vset.pattern.permute.xlu2 %v853_v1 }
 0x191   :  { %v237_v58 = vpop.permute.xlu2 %236 }
 0x192   :  { %v239_v59 = vmul.f32 %v237_v58, %v907_v23 }
 0x194   :  { %v240_v63 = vadd.f32 %v913_v25, %v239_v59 }
 0x19a   :  { %v255_v60 = vpop.permute.xlu2 %254 }
 0x19b   :  { %v257_v11 = vmul.f32 %v255_v60, %v922_v32 }
 0x1a3   :  { %v270_v13 = vpop.permute.xlu2 %269 }
 0x1a4   :  { %v272_v17 = vmul.f32 %v270_v13, %v934_v41  ;;  %v288_v24 = vmul.f32 %v270_v13, %v881_v3 }
 0x1a8   :  { %v249_v61 = vpop.permute.xlu1 %248  ;;  %v243_v62 = vpop.permute.xlu0 %242 }
 0x1a9   :  { %v245_v0 = vmul.f32 %v243_v62, %v915_v26  ;;  %v251_v8 = vmul.f32 %v249_v61, %v919_v29 }
 0x1ab   :  { %v246_v7 = vadd.f32 %v245_v0, %v240_v63 }
 0x1ad   :  { %v252_v10 = vadd.f32 %v251_v8, %v246_v7 }
 0x1af   :  { %v258_v14 = vadd.f32 %v257_v11, %v252_v10 }
 0x1b1   :  { %v264_v12 = vpop.permute.xlu1 %263 }
 0x1b2   :  { %v266_v15 = vmul.f32 %v264_v12, %v928_v38  ;;  %v287_v18 = vmul.f32 %v264_v12, %v879_v2  ;;  %v276_v19 = vpop.permute.xlu0 %275 }
 0x1b3   :  { %v278_v27 = vmul.f32 %v276_v19, %v936_v42  ;;  %v290_v35 = vmul.f32 %v276_v19, %v883_v4 }
 0x1b4   :  { %v267_v16 = vadd.f32 %v266_v15, %v258_v14  ;;  %v289_v28 = vadd.f32 %v288_v24, %v287_v18 }
 0x1b6   :  { %v273_v22 = vadd.f32 %v272_v17, %v267_v16  ;;  %v291_v40 = vadd.f32 %v290_v35, %v289_v28 }
 0x1b8   :  { %v279_v33 = vadd.f32 %v278_v27, %v273_v22 }
 0x1ba   :  { %v282_v31 = vpop.permute.xlu1 %281 }
 0x1bb   :  { %v284_v34 = vmul.f32 %v282_v31, %v938_v44  ;;  %v292_v36 = vmul.f32 %v282_v31, %v885_v5  ;;  %v76_v31 = vld [vmem:[%s75_s27] sm:$0x1] }
 0x1bd   :  { %v285_v39 = vadd.f32 %v284_v34, %v279_v33  ;;  %v293_v45 = vadd.f32 %v292_v36, %v291_v40  ;;  %v78_v36 = vrot.slane %v76_v31, 7  ;;  %v73_v40 = vld [vmem:[%s72_s30] sm:$0x1] }
 0x1bf   :  { %816 = vtanh.f32 %v285_v39  ;;  %v319_v48 = vadd.f32 %v293_v45, %v70_v46  ;;  %v80_v45 = vsel %vm39_vm0, %v73_v40, %v78_v36 }
 0x1c1   :  { %818 = vtanh.f32 %v319_v48 }
 0x1c5   :  { %v817_v49 = vpop.eup %816 }
 0x1c6   :  { %314 = vperm.xlu0 %758, %v817_v49   ;;  %302 = vperm.xlu1 %756, %v817_v49   ;;  %v604_v51 = vrot.slane %v817_v49, 7  ;;  %v589_v52 = vrot.slane %v817_v49, 6 }
 0x1c7   :  { %296 = vperm.xlu2 %755, %v817_v49   ;;  %v819_v58 = vpop.eup %818 }
 0x1c8   :  { %v1025_v55 = vsel %vm617_vm1, %v629_v53, %v604_v51  ;;  %v1027_v57 = vsel %vm617_vm1, %v616_v54, %v589_v52 }
 0x1ce   :  { %759 = vset.pattern.permute.xlu1 %v853_v1  ;;  %763 = vset.pattern.permute.xlu0 %v853_v1 }
 0x1cf   :  { %757 = vset.pattern.permute.xlu2 %v854_v9  ;;  %323 = vperm.xlu1 %759, %v819_v58  }
 0x1d0   :  { %308 = vperm.xlu2 %757, %v817_v49  }
 0x1d7   :  { %761 = vset.pattern.permute.xlu1 %v854_v9 }
 0x1d8   :  { %760 = vset.pattern.permute.xlu2 %v855_v20  ;;  %335 = vperm.xlu1 %761, %v819_v58  }
 0x1d9   :  { %329 = vperm.xlu2 %760, %v819_v58  }
 0x1e0   :  { %764 = vset.pattern.permute.xlu1 %v855_v20 }
 0x1e1   :  { %762 = vset.pattern.permute.xlu2 %v856_v21 }
 0x1e2   :  { %341 = vperm.xlu2 %762, %v819_v58  }
 0x1ea   :  { %765 = vset.pattern.permute.xlu2 %v854_v9 }
 0x221   :  { %v297_v6 = vpop.permute.xlu2 %296 }
 0x222   :  { %v299_v59 = vmul.f32 %v297_v6, %v907_v23 }
 0x224   :  { %v300_v62 = vadd.f32 %v913_v25, %v299_v59 }
 0x22a   :  { %v309_v56 = vpop.permute.xlu2 %308 }
 0x22b   :  { %v311_v0 = vmul.f32 %v309_v56, %v919_v29 }
 0x233   :  { %v330_v7 = vpop.permute.xlu2 %329 }
 0x234   :  { %v332_v17 = vmul.f32 %v330_v7, %v934_v41  ;;  %v348_v18 = vmul.f32 %v330_v7, %v881_v3 }
 0x238   :  { %v303_v60 = vpop.permute.xlu1 %302  ;;  %v315_v8 = vpop.permute.xlu0 %314 }
 0x239   :  { %v305_v61 = vmul.f32 %v303_v60, %v915_v26  ;;  %v317_v12 = vmul.f32 %v315_v8, %v922_v32 }
 0x23b   :  { %v306_v63 = vadd.f32 %v305_v61, %v300_v62 }
 0x23c   :  { %v342_v19 = vpop.permute.xlu2 %341 }
 0x23d   :  { %v312_v10 = vadd.f32 %v311_v0, %v306_v63  ;;  %v344_v33 = vmul.f32 %v342_v19, %v938_v44  ;;  %v352_v39 = vmul.f32 %v342_v19, %v885_v5 }
 0x23f   :  { %v318_v14 = vadd.f32 %v317_v12, %v312_v10 }
 0x241   :  { %v324_v11 = vpop.permute.xlu1 %323 }
 0x242   :  { %v326_v13 = vmul.f32 %v324_v11, %v928_v38  ;;  %v347_v16 = vmul.f32 %v324_v11, %v879_v2 }
 0x244   :  { %v327_v15 = vadd.f32 %v326_v13, %v318_v14  ;;  %v349_v30 = vadd.f32 %v348_v18, %v347_v16 }
 0x246   :  { %v333_v24 = vadd.f32 %v332_v17, %v327_v15 }
 0x24a   :  { %v336_v22 = vpop.permute.xlu1 %335 }
 0x24b   :  { %v338_v27 = vmul.f32 %v336_v22, %v936_v42  ;;  %v350_v28 = vmul.f32 %v336_v22, %v883_v4  ;;  %v86_v22 = vld [vmem:[%s85_s7] sm:$0x1] }
 0x24d   :  { %v339_v34 = vadd.f32 %v338_v27, %v333_v24  ;;  %v351_v35 = vadd.f32 %v350_v28, %v349_v30  ;;  %v88_v30 = vrot.slane %v86_v22, 7 }
 0x24f   :  { %v345_v37 = vadd.f32 %v344_v33, %v339_v34  ;;  %v353_v43 = vadd.f32 %v352_v39, %v351_v35  ;;  %v83_v34 = vld [vmem:[%s82_s10] sm:$0x1] }
 0x250   :  { %v90_v36 = vsel %vm39_vm0, %v83_v34, %v88_v30 }
 0x251   :  { %820 = vtanh.f32 %v345_v37  ;;  %v379_v46 = vadd.f32 %v353_v43, %v80_v45 }
 0x253   :  { %822 = vtanh.f32 %v379_v46 }
 0x257   :  { %v821_v47 = vpop.eup %820 }
 0x258   :  { %368 = vperm.xlu2 %765, %v821_v47   ;;  %362 = vperm.xlu1 %764, %v821_v47   ;;  %v606_v48 = vrot.slane %v821_v47, 6  ;;  %v591_v49 = vrot.slane %v821_v47, 5 }
 0x259   :  { %356 = vperm.xlu0 %763, %v821_v47   ;;  %v823_v52 = vpop.eup %822 }
 0x25a   :  { %v1058_v50 = vsel %vm619_vm2, %v1025_v55, %v606_v48  ;;  %v1061_v51 = vsel %vm619_vm2, %v1027_v57, %v591_v49 }
 0x260   :  { %766 = vset.pattern.permute.xlu2 %v853_v1  ;;  %768 = vset.pattern.permute.xlu1 %v856_v21 }
 0x261   :  { %767 = vset.pattern.permute.xlu0 %v855_v20  ;;  %383 = vperm.xlu2 %766, %v823_v52  }
 0x262   :  { %374 = vperm.xlu1 %768, %v821_v47   ;;  %389 = vperm.xlu0 %767, %v823_v52  }
 0x269   :  { %770 = vset.pattern.permute.xlu2 %v856_v21 }
 0x26a   :  { %769 = vset.pattern.permute.xlu1 %v854_v9  ;;  %401 = vperm.xlu2 %770, %v823_v52  }
 0x26b   :  { %395 = vperm.xlu1 %769, %v823_v52   ;;  %774 = vset.pattern.permute.xlu0 %v854_v9 }
 0x272   :  { %772 = vset.pattern.permute.xlu2 %v855_v20 }
 0x273   :  { %771 = vset.pattern.permute.xlu1 %v853_v1 }
 0x2b2   :  { %v369_v53 = vpop.permute.xlu2 %368 }
 0x2b3   :  { %v371_v59 = vmul.f32 %v369_v53, %v919_v29 }
 0x2bb   :  { %v384_v60 = vpop.permute.xlu2 %383 }
 0x2bc   :  { %v386_v7 = vmul.f32 %v384_v60, %v928_v38  ;;  %v407_v13 = vmul.f32 %v384_v60, %v879_v2 }
 0x2c4   :  { %v402_v14 = vpop.permute.xlu2 %401 }
 0x2c5   :  { %v404_v24 = vmul.f32 %v402_v14, %v938_v44  ;;  %v412_v33 = vmul.f32 %v402_v14, %v885_v5 }
 0x2ca   :  { %v363_v54 = vpop.permute.xlu1 %362 }
 0x2cb   :  { %v357_v55 = vpop.permute.xlu0 %356  ;;  %v365_v6 = vmul.f32 %v363_v54, %v915_v26 }
 0x2cc   :  { %v359_v57 = vmul.f32 %v357_v55, %v907_v23 }
 0x2ce   :  { %v360_v58 = vadd.f32 %v913_v25, %v359_v57 }
 0x2d0   :  { %v366_v56 = vadd.f32 %v365_v6, %v360_v58 }
 0x2d2   :  { %v372_v62 = vadd.f32 %v371_v59, %v366_v56 }
 0x2d4   :  { %v375_v61 = vpop.permute.xlu1 %374  ;;  %v390_v8 = vpop.permute.xlu0 %389 }
 0x2d5   :  { %v377_v63 = vmul.f32 %v375_v61, %v922_v32  ;;  %v408_v11 = vmul.f32 %v390_v8, %v881_v3  ;;  %v392_v12 = vmul.f32 %v390_v8, %v934_v41  ;;  %v96_v61 = vld [vmem:[%s95_s15] sm:$0x1] }
 0x2d7   :  { %v378_v0 = vadd.f32 %v377_v63, %v372_v62  ;;  %v409_v19 = vadd.f32 %v408_v11, %v407_v13 }
 0x2d9   :  { %v387_v10 = vadd.f32 %v386_v7, %v378_v0 }
 0x2db   :  { %v393_v16 = vadd.f32 %v392_v12, %v387_v10  ;;  %v98_v12 = vrot.slane %v96_v61, 7 }
 0x2dd   :  { %v396_v15 = vpop.permute.xlu1 %395 }
 0x2de   :  { %v398_v17 = vmul.f32 %v396_v15, %v936_v42  ;;  %v410_v18 = vmul.f32 %v396_v15, %v883_v4  ;;  %v93_v15 = vld [vmem:[%s92_s17] sm:$0x1] }
 0x2e0   :  { %v399_v27 = vadd.f32 %v398_v17, %v393_v16  ;;  %v411_v28 = vadd.f32 %v410_v18, %v409_v19 }
 0x2e2   :  { %v405_v31 = vadd.f32 %v404_v24, %v399_v27  ;;  %v413_v35 = vadd.f32 %v412_v33, %v411_v28  ;;  %v100_v27 = vsel %vm39_vm0, %v93_v15, %v98_v12  ;;  %v103_v15 = vld [vmem:[%s102_s25] sm:$0x1] }
 0x2e4   :  { %824 = vtanh.f32 %v405_v31  ;;  %v439_v37 = vadd.f32 %v413_v35, %v90_v36 }
 0x2e6   :  { %826 = vtanh.f32 %v439_v37 }
 0x2ea   :  { %v825_v39 = vpop.eup %824 }
 0x2eb   :  { %428 = vperm.xlu0 %774, %v825_v39   ;;  %422 = vperm.xlu2 %772, %v825_v39   ;;  %v608_v40 = vrot.slane %v825_v39, 5  ;;  %v593_v43 = vrot.slane %v825_v39, 4 }
 0x2ec   :  { %416 = vperm.xlu1 %771, %v825_v39   ;;  %v827_v47 = vpop.eup %826 }
 0x2ed   :  { %v1092_v45 = vsel %vm621_vm3, %v1058_v50, %v608_v40  ;;  %v1095_v46 = vsel %vm621_vm3, %v1061_v51, %v593_v43 }
 0x2f3   :  { %778 = vset.pattern.permute.xlu0 %v856_v21  ;;  %773 = vset.pattern.permute.xlu2 %v853_v1 }
 0x2f4   :  { %775 = vset.pattern.permute.xlu1 %v856_v21  ;;  %461 = vperm.xlu0 %778, %v827_v47  }
 0x2f5   :  { %443 = vperm.xlu2 %773, %v827_v47   ;;  %434 = vperm.xlu1 %775, %v825_v39  }
 0x2fc   :  { %779 = vset.pattern.permute.xlu0 %v853_v1 }
 0x2fd   :  { %777 = vset.pattern.permute.xlu2 %v854_v9  ;;  %776 = vset.pattern.permute.xlu1 %v855_v20 }
 0x2fe   :  { %455 = vperm.xlu2 %777, %v827_v47   ;;  %449 = vperm.xlu1 %776, %v827_v47  }
 0x306   :  { %781 = vset.pattern.permute.xlu2 %v855_v20  ;;  %780 = vset.pattern.permute.xlu1 %v853_v1 }
 0x345   :  { %v423_v48 = vpop.permute.xlu2 %422 }
 0x346   :  { %v425_v52 = vmul.f32 %v423_v48, %v915_v26 }
 0x34f   :  { %v444_v53 = vpop.permute.xlu2 %443 }
 0x350   :  { %v446_v60 = vmul.f32 %v444_v53, %v928_v38  ;;  %v467_v0 = vmul.f32 %v444_v53, %v879_v2 }
 0x358   :  { %v456_v62 = vpop.permute.xlu2 %455 }
 0x359   :  { %v458_v13 = vmul.f32 %v456_v62, %v936_v42  ;;  %v470_v14 = vmul.f32 %v456_v62, %v883_v4 }
 0x35d   :  { %v429_v54 = vpop.permute.xlu0 %428 }
 0x35e   :  { %v417_v49 = vpop.permute.xlu1 %416  ;;  %v431_v58 = vmul.f32 %v429_v54, %v919_v29 }
 0x35f   :  { %v419_v50 = vmul.f32 %v417_v49, %v907_v23 }
 0x361   :  { %v420_v51 = vadd.f32 %v913_v25, %v419_v50 }
 0x363   :  { %v426_v55 = vadd.f32 %v425_v52, %v420_v51 }
 0x365   :  { %v432_v56 = vadd.f32 %v431_v58, %v426_v55 }
 0x366   :  { %v462_v11 = vpop.permute.xlu0 %461 }
 0x367   :  { %v435_v57 = vpop.permute.xlu1 %434  ;;  %v464_v18 = vmul.f32 %v462_v11, %v938_v44  ;;  %v472_v19 = vmul.f32 %v462_v11, %v885_v5 }
 0x368   :  { %v437_v6 = vmul.f32 %v435_v57, %v922_v32 }
 0x36a   :  { %v438_v59 = vadd.f32 %v437_v6, %v432_v56 }
 0x36c   :  { %v447_v7 = vadd.f32 %v446_v60, %v438_v59 }
 0x370   :  { %v450_v63 = vpop.permute.xlu1 %449 }
 0x371   :  { %v452_v8 = vmul.f32 %v450_v63, %v934_v41  ;;  %v468_v10 = vmul.f32 %v450_v63, %v881_v3 }
 0x373   :  { %v453_v16 = vadd.f32 %v452_v8, %v447_v7  ;;  %v469_v17 = vadd.f32 %v468_v10, %v467_v0  ;;  %v106_v7 = vld [vmem:[%s105_s22] sm:$0x1] }
 0x375   :  { %v459_v22 = vadd.f32 %v458_v13, %v453_v16  ;;  %v471_v24 = vadd.f32 %v470_v14, %v469_v17  ;;  %v108_v13 = vrot.slane %v106_v7, 7 }
 0x377   :  { %v465_v28 = vadd.f32 %v464_v18, %v459_v22  ;;  %v473_v30 = vadd.f32 %v472_v19, %v471_v24  ;;  %v110_v17 = vsel %vm39_vm0, %v103_v15, %v108_v13 }
 0x379   :  { %828 = vtanh.f32 %v465_v28  ;;  %v499_v31 = vadd.f32 %v473_v30, %v100_v27 }
 0x37b   :  { %830 = vtanh.f32 %v499_v31 }
 0x37f   :  { %v829_v33 = vpop.eup %828 }
 0x380   :  { %482 = vperm.xlu2 %781, %v829_v33   ;;  %476 = vperm.xlu1 %780, %v829_v33   ;;  %v610_v34 = vrot.slane %v829_v33, 4  ;;  %v595_v35 = vrot.slane %v829_v33, 3 }
 0x381   :  { %v831_v36 = vpop.eup %830 }
 0x382   :  { %503 = vperm.xlu0 %779, %v831_v36   ;;  %v1126_v37 = vsel %vm623_vm4, %v1092_v45, %v610_v34  ;;  %v1129_v39 = vsel %vm623_vm4, %v1095_v46, %v595_v35 }
 0x388   :  { %784 = vset.pattern.permute.xlu2 %v856_v21  ;;  %782 = vset.pattern.permute.xlu1 %v854_v9 }
 0x389   :  { %494 = vperm.xlu2 %784, %v829_v33   ;;  %488 = vperm.xlu1 %782, %v829_v33  }
 0x38a   :  { %788 = vset.pattern.permute.xlu0 %v855_v20 }
 0x391   :  { %785 = vset.pattern.permute.xlu2 %v854_v9  ;;  %783 = vset.pattern.permute.xlu1 %v855_v20 }
 0x392   :  { %515 = vperm.xlu2 %785, %v831_v36   ;;  %509 = vperm.xlu1 %783, %v831_v36  }
 0x39a   :  { %786 = vset.pattern.permute.xlu1 %v856_v21  ;;  %787 = vset.pattern.permute.xlu2 %v853_v1 }
 0x39b   :  { %521 = vperm.xlu1 %786, %v831_v36  }
 0x3a3   :  { %789 = vset.pattern.permute.xlu1 %v854_v9 }
 0x3da   :  { %v483_v43 = vpop.permute.xlu2 %482 }
 0x3db   :  { %v485_v48 = vmul.f32 %v483_v43, %v915_v26 }
 0x3e3   :  { %v495_v51 = vpop.permute.xlu2 %494 }
 0x3e4   :  { %v497_v53 = vmul.f32 %v495_v51, %v922_v32 }
 0x3ec   :  { %v516_v59 = vpop.permute.xlu2 %515 }
 0x3ed   :  { %v518_v63 = vmul.f32 %v516_v59, %v936_v42 }
 0x3f2   :  { %v477_v40 = vpop.permute.xlu1 %476 }
 0x3f3   :  { %v479_v45 = vmul.f32 %v477_v40, %v907_v23 }
 0x3f4   :  { %v504_v54 = vpop.permute.xlu0 %503 }
 0x3f5   :  { %v480_v46 = vadd.f32 %v913_v25, %v479_v45  ;;  %v506_v58 = vmul.f32 %v504_v54, %v928_v38  ;;  %v527_v62 = vmul.f32 %v504_v54, %v879_v2 }
 0x3f7   :  { %v486_v50 = vadd.f32 %v485_v48, %v480_v46 }
 0x3fb   :  { %v489_v47 = vpop.permute.xlu1 %488 }
 0x3fc   :  { %v491_v49 = vmul.f32 %v489_v47, %v919_v29 }
 0x3fe   :  { %v492_v52 = vadd.f32 %v491_v49, %v486_v50 }
 0x400   :  { %v498_v55 = vadd.f32 %v497_v53, %v492_v52 }
 0x402   :  { %v507_v56 = vadd.f32 %v506_v58, %v498_v55 }
 0x404   :  { %v510_v57 = vpop.permute.xlu1 %509 }
 0x405   :  { %v512_v6 = vmul.f32 %v510_v57, %v934_v41  ;;  %v528_v60 = vmul.f32 %v510_v57, %v881_v3  ;;  %v530_v3 = vmul.f32 %v516_v59, %v883_v4 }
 0x407   :  { %v513_v61 = vadd.f32 %v512_v6, %v507_v56  ;;  %v529_v0 = vadd.f32 %v528_v60, %v527_v62  ;;  %v805_v56 = vld [vmem:[%s1197_s1 + $0x15] ss:$0 sm:$0xff] }
 0x409   :  { %v519_v10 = vadd.f32 %v518_v63, %v513_v61  ;;  %v531_v2 = vadd.f32 %v530_v3, %v529_v0 }
 0x40d   :  { %v522_v8 = vpop.permute.xlu1 %521 }
 0x40e   :  { %v524_v11 = vmul.f32 %v522_v8, %v938_v44  ;;  %v532_v12 = vmul.f32 %v522_v8, %v885_v5 }
 0x410   :  { %v525_v14 = vadd.f32 %v524_v11, %v519_v10  ;;  %v533_v16 = vadd.f32 %v532_v12, %v531_v2 }
 0x412   :  { %832 = vtanh.f32 %v525_v14  ;;  %v559_v18 = vadd.f32 %v533_v16, %v110_v17 }
 0x414   :  { %834 = vtanh.f32 %v559_v18 }
 0x418   :  { %v833_v19 = vpop.eup %832 }
 0x419   :  { %548 = vperm.xlu1 %789, %v833_v19   ;;  %542 = vperm.xlu0 %788, %v833_v19   ;;  %v612_v22 = vrot.slane %v833_v19, 3  ;;  %v597_v24 = vrot.slane %v833_v19, 2 }
 0x41a   :  { %536 = vperm.xlu2 %787, %v833_v19   ;;  %v835_v27 = vpop.eup %834 }
 0x41b   :  { %v634_v4 = vsel %vm625_vm5, %v1126_v37, %v612_v22  ;;  %v626_v5 = vsel %vm625_vm5, %v1129_v39, %v597_v24 }
 0x421   :  { %790 = vset.pattern.permute.xlu1 %v853_v1  ;;  %793 = vset.pattern.permute.xlu0 %v854_v9 }
 0x422   :  { %791 = vset.pattern.permute.xlu2 %v856_v21  ;;  %563 = vperm.xlu1 %790, %v835_v27  }
 0x423   :  { %575 = vperm.xlu0 %793, %v835_v27   ;;  %554 = vperm.xlu2 %791, %v833_v19  }
 0x42a   :  { %794 = vset.pattern.permute.xlu1 %v856_v21 }
 0x42b   :  { %792 = vset.pattern.permute.xlu2 %v855_v20  ;;  %581 = vperm.xlu1 %794, %v835_v27  }
 0x42c   :  { %569 = vperm.xlu2 %792, %v835_v27   ;;  %798 = vset.pattern.permute.xlu0 %v855_v20 }
 0x433   :  { %796 = vset.pattern.permute.xlu1 %v853_v1 }
 0x434   :  { %795 = vset.pattern.permute.xlu2 %v853_v1 }
 0x474   :  { %v537_v28 = vpop.permute.xlu2 %536 }
 0x475   :  { %v539_v30 = vmul.f32 %v537_v28, %v907_v23 }
 0x477   :  { %v540_v35 = vadd.f32 %v913_v25, %v539_v30 }
 0x47d   :  { %v555_v31 = vpop.permute.xlu2 %554 }
 0x47e   :  { %v557_v43 = vmul.f32 %v555_v31, %v922_v32 }
 0x486   :  { %v570_v46 = vpop.permute.xlu2 %569 }
 0x487   :  { %v572_v23 = vmul.f32 %v570_v46, %v934_v41 }
 0x48b   :  { %v549_v33 = vpop.permute.xlu1 %548  ;;  %v543_v34 = vpop.permute.xlu0 %542 }
 0x48c   :  { %v545_v36 = vmul.f32 %v543_v34, %v915_v26  ;;  %v551_v39 = vmul.f32 %v549_v33, %v919_v29 }
 0x48e   :  { %v546_v37 = vadd.f32 %v545_v36, %v540_v35 }
 0x490   :  { %v552_v40 = vadd.f32 %v551_v39, %v546_v37 }
 0x492   :  { %v558_v47 = vadd.f32 %v557_v43, %v552_v40 }
 0x494   :  { %v564_v45 = vpop.permute.xlu1 %563 }
 0x495   :  { %v566_v1 = vmul.f32 %v564_v45, %v928_v38  ;;  %v576_v49 = vpop.permute.xlu0 %575 }
 0x496   :  { %v578_v25 = vmul.f32 %v576_v49, %v936_v42 }
 0x497   :  { %v567_v48 = vadd.f32 %v566_v1, %v558_v47 }
 0x499   :  { %v573_v50 = vadd.f32 %v572_v23, %v567_v48 }
 0x49b   :  { %v579_v26 = vadd.f32 %v578_v25, %v573_v50 }
 0x49d   :  { %v582_v51 = vpop.permute.xlu1 %581 }
 0x49e   :  { %v584_v52 = vmul.f32 %v582_v51, %v938_v44  ;;  %v28_v44 = vld [vmem:[%s1197_s1 + $0x11] sm:$0xf] }
 0x49f   :  { %v646_v58 = vperm.slane %v28_v44, 0  ;;  %v673_v59 = vperm.slane %v28_v44, 2  ;;  %v686_v62 = vperm.slane %v28_v44, 3 }
 0x4a0   :  { %v585_v29 = vadd.f32 %v584_v52, %v579_v26 }
 0x4a2   :  { %836 = vtanh.f32 %v585_v29 }
 0x4a8   :  { %v837_v53 = vpop.eup %836 }
 0x4a9   :  { %v614_v32 = vrot.slane %v837_v53, 2  ;;  %v600_v54 = vrot.slane %v837_v53, 1 }
 0x4ab   :  { %v635_v55 = vsel %vm627_vm6, %v634_v4, %v614_v32  ;;  %v628_v57 = vsel %vm627_vm6, %v626_v5, %v600_v54 }
 0x4ac   :  { %657 = vperm.xlu0 %798, %v635_v55   ;;  %643 = vperm.xlu1 %796, %v635_v55  }
 0x4ad   :  { %638 = vperm.xlu2 %795, %v628_v57  }
 0x4b4   :  { %799 = vset.pattern.permute.xlu1 %v854_v9  ;;  %803 = vset.pattern.permute.xlu0 %v856_v21 }
 0x4b5   :  { %797 = vset.pattern.permute.xlu2 %v855_v20  ;;  %666 = vperm.xlu1 %799, %v628_v57  }
 0x4b6   :  { %653 = vperm.xlu2 %797, %v628_v57  }
 0x4bd   :  { %801 = vset.pattern.permute.xlu1 %v856_v21 }
 0x4be   :  { %800 = vset.pattern.permute.xlu2 %v854_v9  ;;  %679 = vperm.xlu1 %801, %v628_v57   ;;  %v660_v9 = vperm.slane %v28_v44, 1 }
 0x4bf   :  { %670 = vperm.xlu2 %800, %v635_v55  }
 0x4c7   :  { %802 = vset.pattern.permute.xlu2 %v856_v21 }
 0x4c8   :  { %683 = vperm.xlu2 %802, %v635_v55  }
 0x507   :  { %v639_v38 = vpop.permute.xlu2 %638 }
 0x508   :  { %v647_v12 = vmul.f32 %v646_v58, %v639_v38 }
 0x50a   :  { %v650_v14 = vadd.f32 %v805_v56, %v647_v12 }
 0x510   :  { %v654_v41 = vpop.permute.xlu2 %653 }
 0x511   :  { %v661_v13 = vmul.f32 %v660_v9, %v654_v41 }
 0x513   :  { %v663_v2 = vadd.f32 %v661_v13, %v650_v14 }
 0x519   :  { %v671_v42 = vpop.permute.xlu2 %670 }
 0x51a   :  { %v675_v0 = vmul.f32 %v673_v59, %v671_v42 }
 0x51e   :  { %v658_v20 = vpop.permute.xlu0 %657  ;;  %v644_v6 = vpop.permute.xlu1 %643 }
 0x51f   :  { %v648_v60 = vmul.f32 %v646_v58, %v644_v6  ;;  %v662_v61 = vmul.f32 %v660_v9, %v658_v20 }
 0x521   :  { %v651_v21 = vadd.f32 %v805_v56, %v648_v60 }
 0x522   :  { %v684_v63 = vpop.permute.xlu2 %683 }
 0x523   :  { %v664_v7 = vadd.f32 %v662_v61, %v651_v21  ;;  %v688_v10 = vmul.f32 %v686_v62, %v684_v63 }
 0x525   :  { %v677_v8 = vadd.f32 %v675_v0, %v664_v7 }
 0x527   :  { %v690_v11 = vadd.f32 %v688_v10, %v677_v8  ;;  %v667_v3 = vpop.permute.xlu1 %666 }
 0x528   :  { %v674_v15 = vmul.f32 %v673_v59, %v667_v3 }
 0x529   :  { %693 = vst.msk [vmem:[%s1198_s2 + $0x8] sm:$0xff] %vm691_vm7, %v690_v11 }
 0x52a   :  { %v676_v17 = vadd.f32 %v674_v15, %v663_v2 }
 0x530   :  { %v680_v16 = vpop.permute.xlu1 %679 }
 0x531   :  { %v687_v18 = vmul.f32 %v686_v62, %v680_v16 }
 0x533   :  { %v689_v19 = vadd.f32 %v687_v18, %v676_v17 }
 0x535   :  { %692 = vst.msk [vmem:[%s1198_s2] sm:$0xff] %vm691_vm7, %v689_v19 }
 0x536   :  { %698 = vsyncpa [#allocation3], 1 }

</bundles_post_ra>
